<compile_context>
chip_gen: v7x
topology: tpu7x:2x2x1
jax: 0.10.0
libtpu: 0.0.40
codegen_flags: <defaults>
</compile_context>

<pallas_src>
import math

import jax
import jax.numpy as jnp
from jax.experimental import pallas as pl
from jax.experimental.pallas import tpu as pltpu

D_MODEL = 32
HEADS = 8
D_FF = 64
SEQ = 8
BATCH = 2
EPS = 1e-6
NEG_INF = -1e18


def _layer_norm(x, gamma, beta):
    mu = jnp.mean(x, axis=-1, keepdims=True)
    var = jnp.mean((x - mu) ** 2, axis=-1, keepdims=True)
    return (x - mu) * jax.lax.rsqrt(var + EPS) * gamma + beta


def encoder_layer_kernel(
    x_ref, mask_ref,
    wqkv_ref, bqkv_ref, wo_ref, w1_ref, b1_ref, w2_ref, vec_ref,
    out_ref, attn_ref,
):
    B, S, D = x_ref.shape
    H = HEADS
    dh = D // H
    BS = B * S

    # packed (8, D) vector slab: ln1_g, ln1_b, ln2_g, ln2_b, bo, b2, pad, pad
    ln1_g = vec_ref[0:1, :]
    ln1_b = vec_ref[1:2, :]
    ln2_g = vec_ref[2:3, :]
    ln2_b = vec_ref[3:4, :]
    bo = vec_ref[4:5, :]
    b2 = vec_ref[5:6, :]

    x = x_ref[...].reshape(BS, D).astype(jnp.float32)

    # ---- pre-attention LayerNorm (eps=1e-6) ----
    xn = _layer_norm(x, ln1_g, ln1_b)

    # ---- fused Q/K/V projection (one MXU push); 1/sqrt(dh) folded into Wq/bq ----
    qkv = jnp.dot(xn, wqkv_ref[...], preferred_element_type=jnp.float32) + bqkv_ref[...]
    q = qkv[:, 0 * D:1 * D].reshape(B, S, D)
    k = qkv[:, 1 * D:2 * D].reshape(B, S, D)
    v = qkv[:, 2 * D:3 * D].reshape(B, S, D)

    def to_heads(t):
        # (B, S, D) -> (B*H, S, dh): lane slices + leading-axis stack/reshape only.
        return jnp.stack(
            [t[:, :, h * dh:(h + 1) * dh] for h in range(H)], axis=1
        ).reshape(B * H, S, dh)

    qh = to_heads(q)
    kh = to_heads(k)
    vh = to_heads(v)

    # ---- head-batched scaled dot-product attention ----
    s = jnp.einsum('bqd,bkd->bqk', qh, kh,
                   preferred_element_type=jnp.float32)          # (B*H, S, S)

    maskb = (mask_ref[...] != 0).reshape(B, 1, 1, S)
    mask_bh = jnp.broadcast_to(maskb, (B, H, 1, S)).reshape(B * H, 1, S)
    s = jnp.where(mask_bh, NEG_INF, s)                          # masked_fill(mask, -1e18)

    m = jnp.max(s, axis=-1, keepdims=True)
    e = jnp.exp(s - m)
    p = e * pl.reciprocal(jnp.sum(e, axis=-1, keepdims=True), approx=True)

    ctx = jnp.einsum('bqk,bkd->bqd', p, vh,
                     preferred_element_type=jnp.float32)        # (B*H, S, dh)
    ctx4 = ctx.reshape(B, H, S, dh)
    ctx2 = jnp.concatenate([ctx4[:, h] for h in range(H)], axis=-1).reshape(BS, D)

    attn_out = jnp.dot(ctx2, wo_ref[...], preferred_element_type=jnp.float32) + bo

    # residual: dropout(context) + inputs   (dropout = identity at inference)
    out1 = attn_out + x

    # ---- PositionwiseFeedForward: LN -> w1 -> relu -> w2 -> +residual ----
    yn = _layer_norm(out1, ln2_g, ln2_b)
    hdn = jnp.maximum(
        jnp.dot(yn, w1_ref[...], preferred_element_type=jnp.float32) + b1_ref[...],
        0.0)
    ffn = jnp.dot(hdn, w2_ref[...], preferred_element_type=jnp.float32) + b2
    out_ref[...] = (ffn + out1).reshape(B, S, D).astype(out_ref.dtype)

    # ---- attention post-processing, reduced in-kernel ----
    # PyTorch forward: list(_attns.squeeze(0)); elementwise sum of the list; / 8.
    p4 = p.reshape(B, H, S, S)
    if B == 1:
        attn_ref[...] = (jnp.sum(p4[0], axis=0) * 0.125).astype(attn_ref.dtype)
    else:
        attn_ref[...] = (jnp.sum(p4, axis=0) * 0.125).astype(attn_ref.dtype)


def _pack_params(params):
    (ln1_g, ln1_b, wq, bq, wk, bk, wv, bv, wo, bo,
     ln2_g, ln2_b, w1, b1, w2, b2) = params
    scale = 1.0 / math.sqrt(D_MODEL // HEADS)
    wqkv = jnp.concatenate([wq * scale, wk, wv], axis=1)         # (D, 3D)
    bqkv = jnp.concatenate([bq * scale, bk, bv], axis=1)         # (1, 3D)
    vec = jnp.concatenate(
        [ln1_g, ln1_b, ln2_g, ln2_b, bo, b2,
         jnp.zeros((2, D_MODEL), jnp.float32)], axis=0)          # (8, D)
    return wqkv, bqkv, wo, w1, b1, w2, vec


def transformer_encoder_layer(x, mask, params):
    B, S, D = x.shape
    H = HEADS
    wqkv, bqkv, wo, w1, b1, w2, vec = _pack_params(params)
    attn_shape = (S, S) if B == 1 else (H, S, S)

    vmem = pl.BlockSpec(memory_space=pltpu.MemorySpace.VMEM)
    out, attn_array = pl.pallas_call(
        encoder_layer_kernel,
        out_shape=(jax.ShapeDtypeStruct((B, S, D), jnp.float32),
                   jax.ShapeDtypeStruct(attn_shape, jnp.float32)),
        in_specs=[vmem] * 9,
        out_specs=(vmem, vmem),
    )(x, mask, wqkv, bqkv, wo, w1, b1, w2, vec)
    return out, attn_array


# ---------------- pure-JAX reference (sanity check only) ----------------
def reference(x, mask, params):
    (ln1_g, ln1_b, wq, bq, wk, bk, wv, bv, wo, bo,
     ln2_g, ln2_b, w1, b1, w2, b2) = params

    def ln(v, g, bt):
        mu = jnp.mean(v, -1, keepdims=True)
        var = jnp.mean((v - mu) ** 2, -1, keepdims=True)
        return (v - mu) / jnp.sqrt(var + EPS) * g + bt

    B, S, D = x.shape
    H, dh = HEADS, D // HEADS
    xn = ln(x, ln1_g, ln1_b)
    q = (xn @ wq + bq).reshape(B, S, H, dh).transpose(0, 2, 1, 3) / math.sqrt(dh)
    k = (xn @ wk + bk).reshape(B, S, H, dh).transpose(0, 2, 1, 3)
    v = (xn @ wv + bv).reshape(B, S, H, dh).transpose(0, 2, 1, 3)
    s = jnp.einsum('bhqd,bhkd->bhqk', q, k)
    s = jnp.where((mask != 0)[:, None, :, :], NEG_INF, s)
    p = jax.nn.softmax(s, axis=-1)
    ctx = jnp.einsum('bhqk,bhkd->bhqd', p, v).transpose(0, 2, 1, 3).reshape(B, S, D)
    ctx = ctx @ wo + bo
    out1 = ctx + x
    yn = ln(out1, ln2_g, ln2_b)
    out = jnp.maximum(yn @ w1 + b1, 0.0) @ w2 + b2 + out1
    a = p
    if a.shape[0] == 1:
        a = jnp.squeeze(a, axis=0)
    attn_array = jnp.sum(a, axis=0) / 8.0
    return out, attn_array


def init_params(key):
    ks = jax.random.split(key, 12)

    def w(k, shape, scale=0.05):
        return jax.random.normal(k, shape, jnp.float32) * scale

    ln1_g = jnp.ones((1, D_MODEL), jnp.float32)
    ln1_b = jnp.zeros((1, D_MODEL), jnp.float32)
    ln2_g = jnp.ones((1, D_MODEL), jnp.float32)
    ln2_b = jnp.zeros((1, D_MODEL), jnp.float32)
    wq = w(ks[0], (D_MODEL, D_MODEL)); bq = w(ks[1], (1, D_MODEL), 0.01)
    wk = w(ks[2], (D_MODEL, D_MODEL)); bk = w(ks[3], (1, D_MODEL), 0.01)
    wv = w(ks[4], (D_MODEL, D_MODEL)); bv = w(ks[5], (1, D_MODEL), 0.01)
    wo = w(ks[6], (D_MODEL, D_MODEL)); bo = w(ks[7], (1, D_MODEL), 0.01)
    w1 = w(ks[8], (D_MODEL, D_FF));    b1 = w(ks[9], (1, D_FF), 0.01)
    w2 = w(ks[10], (D_FF, D_MODEL));   b2 = w(ks[11], (1, D_MODEL), 0.01)
    return (ln1_g, ln1_b, wq, bq, wk, bk, wv, bv, wo, bo,
            ln2_g, ln2_b, w1, b1, w2, b2)


if __name__ == "__main__":
    key = jax.random.PRNGKey(0)
    kx, kp = jax.random.split(key)
    x = jax.random.normal(kx, (BATCH, SEQ, D_MODEL), jnp.float32)
    # batch 0: no padding; batch 1: last 3 key positions padded
    lengths = jnp.array([SEQ, SEQ - 3], dtype=jnp.int32)
    mask = (jnp.arange(SEQ)[None, :] >= lengths[:, None]).astype(jnp.int32)[:, None, :]
    params = init_params(kp)

    out, attn_array = transformer_encoder_layer(x, mask, params)
    jax.block_until_ready((out, attn_array))

    ref_out, ref_attn = reference(x, mask, params)
    assert jnp.allclose(out, ref_out, atol=1e-3, rtol=1e-2)
    assert jnp.allclose(attn_array, ref_attn, atol=1e-3, rtol=1e-2)
    # TODO(synk): dropout / attention_dropout are identity here (inference mode);
    # the PyTorch forward's debug print of the attn list length is omitted.
    print("KERNEL_OK")
</pallas_src>

<mosaic_0001>
module attributes {stable_mosaic.version = 11 : i64} {
  func.func @encoder_layer_kernel(%arg0: memref<2x8x32xf32, #tpu.memory_space<vmem>>, %arg1: memref<2x1x8xi32, #tpu.memory_space<vmem>>, %arg2: memref<32x96xf32, #tpu.memory_space<vmem>>, %arg3: memref<1x96xf32, #tpu.memory_space<vmem>>, %arg4: memref<32x32xf32, #tpu.memory_space<vmem>>, %arg5: memref<32x64xf32, #tpu.memory_space<vmem>>, %arg6: memref<1x64xf32, #tpu.memory_space<vmem>>, %arg7: memref<64x32xf32, #tpu.memory_space<vmem>>, %arg8: memref<8x32xf32, #tpu.memory_space<vmem>>, %arg9: memref<2x8x32xf32, #tpu.memory_space<vmem>>, %arg10: memref<8x8x8xf32, #tpu.memory_space<vmem>>) attributes {dimension_semantics = [], scalar_prefetch = 0 : i64, scratch_operands = 0 : i64, tpu.core_type = #tpu.core_type<tc>} {
    %c0 = arith.constant 0 : index
    %c0_0 = arith.constant 0 : index
    %0 = vector.load %arg8[%c0, %c0_0] : memref<8x32xf32, #tpu.memory_space<vmem>>, vector<1x32xf32>
    %c1 = arith.constant 1 : index
    %c0_1 = arith.constant 0 : index
    %1 = vector.load %arg8[%c1, %c0_1] : memref<8x32xf32, #tpu.memory_space<vmem>>, vector<1x32xf32>
    %c2 = arith.constant 2 : index
    %c0_2 = arith.constant 0 : index
    %2 = vector.load %arg8[%c2, %c0_2] : memref<8x32xf32, #tpu.memory_space<vmem>>, vector<1x32xf32>
    %c3 = arith.constant 3 : index
    %c0_3 = arith.constant 0 : index
    %3 = vector.load %arg8[%c3, %c0_3] : memref<8x32xf32, #tpu.memory_space<vmem>>, vector<1x32xf32>
    %c4 = arith.constant 4 : index
    %c0_4 = arith.constant 0 : index
    %4 = vector.load %arg8[%c4, %c0_4] : memref<8x32xf32, #tpu.memory_space<vmem>>, vector<1x32xf32>
    %c5 = arith.constant 5 : index
    %c0_5 = arith.constant 0 : index
    %5 = vector.load %arg8[%c5, %c0_5] : memref<8x32xf32, #tpu.memory_space<vmem>>, vector<1x32xf32>
    %c0_6 = arith.constant 0 : index
    %c0_7 = arith.constant 0 : index
    %c0_8 = arith.constant 0 : index
    %6 = vector.load %arg0[%c0_6, %c0_7, %c0_8] : memref<2x8x32xf32, #tpu.memory_space<vmem>>, vector<2x8x32xf32>
    %7 = vector.shape_cast %6 : vector<2x8x32xf32> to vector<16x32xf32>
    %cst = arith.constant dense<0.000000e+00> : vector<16xf32>
    %8 = vector.multi_reduction <add>, %7, %cst [1] : vector<16x32xf32> to vector<16xf32>
    %9 = vector.shape_cast %8 : vector<16xf32> to vector<16x1xf32>
    %cst_9 = arith.constant 3.200000e+01 : f32
    %10 = vector.broadcast %cst_9 : f32 to vector<16x1xf32>
    %11 = arith.divf %9, %10 : vector<16x1xf32>
    %12 = vector.broadcast %11 : vector<16x1xf32> to vector<16x32xf32>
    %13 = arith.subf %7, %12 : vector<16x32xf32>
    %14 = arith.mulf %13, %13 : vector<16x32xf32>
    %cst_10 = arith.constant dense<0.000000e+00> : vector<16xf32>
    %15 = vector.multi_reduction <add>, %14, %cst_10 [1] : vector<16x32xf32> to vector<16xf32>
    %16 = vector.shape_cast %15 : vector<16xf32> to vector<16x1xf32>
    %cst_11 = arith.constant 3.200000e+01 : f32
    %17 = vector.broadcast %cst_11 : f32 to vector<16x1xf32>
    %18 = arith.divf %16, %17 : vector<16x1xf32>
    %19 = vector.broadcast %11 : vector<16x1xf32> to vector<16x32xf32>
    %20 = arith.subf %7, %19 : vector<16x32xf32>
    %cst_12 = arith.constant 9.99999997E-7 : f32
    %21 = vector.broadcast %cst_12 : f32 to vector<16x1xf32>
    %22 = arith.addf %18, %21 : vector<16x1xf32>
    %23 = math.rsqrt %22 : vector<16x1xf32>
    %24 = vector.broadcast %23 : vector<16x1xf32> to vector<16x32xf32>
    %25 = arith.mulf %20, %24 : vector<16x32xf32>
    %26 = vector.broadcast %0 : vector<1x32xf32> to vector<16x32xf32>
    %27 = arith.mulf %25, %26 : vector<16x32xf32>
    %28 = vector.broadcast %1 : vector<1x32xf32> to vector<16x32xf32>
    %29 = arith.addf %27, %28 : vector<16x32xf32>
    %c0_13 = arith.constant 0 : index
    %c0_14 = arith.constant 0 : index
    %30 = vector.load %arg2[%c0_13, %c0_14] : memref<32x96xf32, #tpu.memory_space<vmem>>, vector<32x96xf32>
    %cst_15 = arith.constant dense<0.000000e+00> : vector<16x96xf32>
    %31 = tpu.matmul %29, %30, %cst_15 {dimension_numbers = #tpu.dot_dimension_numbers<[1], [0], [0], [1], [0, 0, 1, 1], [], []>} : vector<16x32xf32>, vector<32x96xf32>, vector<16x96xf32> -> vector<16x96xf32>
    %c0_16 = arith.constant 0 : index
    %c0_17 = arith.constant 0 : index
    %32 = vector.load %arg3[%c0_16, %c0_17] : memref<1x96xf32, #tpu.memory_space<vmem>>, vector<1x96xf32>
    %33 = vector.broadcast %32 : vector<1x96xf32> to vector<16x96xf32>
    %34 = arith.addf %31, %33 : vector<16x96xf32>
    %35 = vector.extract_strided_slice %34 {offsets = [0, 0], sizes = [16, 32], strides = [1, 1]} : vector<16x96xf32> to vector<16x32xf32>
    %36 = vector.shape_cast %35 : vector<16x32xf32> to vector<2x8x32xf32>
    %37 = vector.extract_strided_slice %34 {offsets = [0, 32], sizes = [16, 32], strides = [1, 1]} : vector<16x96xf32> to vector<16x32xf32>
    %38 = vector.shape_cast %37 : vector<16x32xf32> to vector<2x8x32xf32>
    %39 = vector.extract_strided_slice %34 {offsets = [0, 64], sizes = [16, 32], strides = [1, 1]} : vector<16x96xf32> to vector<16x32xf32>
    %40 = vector.shape_cast %39 : vector<16x32xf32> to vector<2x8x32xf32>
    %41 = vector.extract_strided_slice %36 {offsets = [0, 0, 0], sizes = [2, 8, 4], strides = [1, 1, 1]} : vector<2x8x32xf32> to vector<2x8x4xf32>
    %42 = vector.extract_strided_slice %36 {offsets = [0, 0, 4], sizes = [2, 8, 4], strides = [1, 1, 1]} : vector<2x8x32xf32> to vector<2x8x4xf32>
    %43 = vector.extract_strided_slice %36 {offsets = [0, 0, 8], sizes = [2, 8, 4], strides = [1, 1, 1]} : vector<2x8x32xf32> to vector<2x8x4xf32>
    %44 = vector.extract_strided_slice %36 {offsets = [0, 0, 12], sizes = [2, 8, 4], strides = [1, 1, 1]} : vector<2x8x32xf32> to vector<2x8x4xf32>
    %45 = vector.extract_strided_slice %36 {offsets = [0, 0, 16], sizes = [2, 8, 4], strides = [1, 1, 1]} : vector<2x8x32xf32> to vector<2x8x4xf32>
    %46 = vector.extract_strided_slice %36 {offsets = [0, 0, 20], sizes = [2, 8, 4], strides = [1, 1, 1]} : vector<2x8x32xf32> to vector<2x8x4xf32>
    %47 = vector.extract_strided_slice %36 {offsets = [0, 0, 24], sizes = [2, 8, 4], strides = [1, 1, 1]} : vector<2x8x32xf32> to vector<2x8x4xf32>
    %48 = vector.extract_strided_slice %36 {offsets = [0, 0, 28], sizes = [2, 8, 4], strides = [1, 1, 1]} : vector<2x8x32xf32> to vector<2x8x4xf32>
    %49 = vector.shape_cast %41 : vector<2x8x4xf32> to vector<2x1x8x4xf32>
    %50 = vector.shape_cast %42 : vector<2x8x4xf32> to vector<2x1x8x4xf32>
    %51 = vector.shape_cast %43 : vector<2x8x4xf32> to vector<2x1x8x4xf32>
    %52 = vector.shape_cast %44 : vector<2x8x4xf32> to vector<2x1x8x4xf32>
    %53 = vector.shape_cast %45 : vector<2x8x4xf32> to vector<2x1x8x4xf32>
    %54 = vector.shape_cast %46 : vector<2x8x4xf32> to vector<2x1x8x4xf32>
    %55 = vector.shape_cast %47 : vector<2x8x4xf32> to vector<2x1x8x4xf32>
    %56 = vector.shape_cast %48 : vector<2x8x4xf32> to vector<2x1x8x4xf32>
    %57 = tpu.concatenate %49, %50, %51, %52, %53, %54, %55, %56 in 1 : vector<2x1x8x4xf32>, vector<2x1x8x4xf32>, vector<2x1x8x4xf32>, vector<2x1x8x4xf32>, vector<2x1x8x4xf32>, vector<2x1x8x4xf32>, vector<2x1x8x4xf32>, vector<2x1x8x4xf32> -> vector<2x8x8x4xf32>
    %58 = vector.shape_cast %57 : vector<2x8x8x4xf32> to vector<16x8x4xf32>
    %59 = vector.extract_strided_slice %38 {offsets = [0, 0, 0], sizes = [2, 8, 4], strides = [1, 1, 1]} : vector<2x8x32xf32> to vector<2x8x4xf32>
    %60 = vector.extract_strided_slice %38 {offsets = [0, 0, 4], sizes = [2, 8, 4], strides = [1, 1, 1]} : vector<2x8x32xf32> to vector<2x8x4xf32>
    %61 = vector.extract_strided_slice %38 {offsets = [0, 0, 8], sizes = [2, 8, 4], strides = [1, 1, 1]} : vector<2x8x32xf32> to vector<2x8x4xf32>
    %62 = vector.extract_strided_slice %38 {offsets = [0, 0, 12], sizes = [2, 8, 4], strides = [1, 1, 1]} : vector<2x8x32xf32> to vector<2x8x4xf32>
    %63 = vector.extract_strided_slice %38 {offsets = [0, 0, 16], sizes = [2, 8, 4], strides = [1, 1, 1]} : vector<2x8x32xf32> to vector<2x8x4xf32>
    %64 = vector.extract_strided_slice %38 {offsets = [0, 0, 20], sizes = [2, 8, 4], strides = [1, 1, 1]} : vector<2x8x32xf32> to vector<2x8x4xf32>
    %65 = vector.extract_strided_slice %38 {offsets = [0, 0, 24], sizes = [2, 8, 4], strides = [1, 1, 1]} : vector<2x8x32xf32> to vector<2x8x4xf32>
    %66 = vector.extract_strided_slice %38 {offsets = [0, 0, 28], sizes = [2, 8, 4], strides = [1, 1, 1]} : vector<2x8x32xf32> to vector<2x8x4xf32>
    %67 = vector.shape_cast %59 : vector<2x8x4xf32> to vector<2x1x8x4xf32>
    %68 = vector.shape_cast %60 : vector<2x8x4xf32> to vector<2x1x8x4xf32>
    %69 = vector.shape_cast %61 : vector<2x8x4xf32> to vector<2x1x8x4xf32>
    %70 = vector.shape_cast %62 : vector<2x8x4xf32> to vector<2x1x8x4xf32>
    %71 = vector.shape_cast %63 : vector<2x8x4xf32> to vector<2x1x8x4xf32>
    %72 = vector.shape_cast %64 : vector<2x8x4xf32> to vector<2x1x8x4xf32>
    %73 = vector.shape_cast %65 : vector<2x8x4xf32> to vector<2x1x8x4xf32>
    %74 = vector.shape_cast %66 : vector<2x8x4xf32> to vector<2x1x8x4xf32>
    %75 = tpu.concatenate %67, %68, %69, %70, %71, %72, %73, %74 in 1 : vector<2x1x8x4xf32>, vector<2x1x8x4xf32>, vector<2x1x8x4xf32>, vector<2x1x8x4xf32>, vector<2x1x8x4xf32>, vector<2x1x8x4xf32>, vector<2x1x8x4xf32>, vector<2x1x8x4xf32> -> vector<2x8x8x4xf32>
    %76 = vector.shape_cast %75 : vector<2x8x8x4xf32> to vector<16x8x4xf32>
    %77 = vector.extract_strided_slice %40 {offsets = [0, 0, 0], sizes = [2, 8, 4], strides = [1, 1, 1]} : vector<2x8x32xf32> to vector<2x8x4xf32>
    %78 = vector.extract_strided_slice %40 {offsets = [0, 0, 4], sizes = [2, 8, 4], strides = [1, 1, 1]} : vector<2x8x32xf32> to vector<2x8x4xf32>
    %79 = vector.extract_strided_slice %40 {offsets = [0, 0, 8], sizes = [2, 8, 4], strides = [1, 1, 1]} : vector<2x8x32xf32> to vector<2x8x4xf32>
    %80 = vector.extract_strided_slice %40 {offsets = [0, 0, 12], sizes = [2, 8, 4], strides = [1, 1, 1]} : vector<2x8x32xf32> to vector<2x8x4xf32>
    %81 = vector.extract_strided_slice %40 {offsets = [0, 0, 16], sizes = [2, 8, 4], strides = [1, 1, 1]} : vector<2x8x32xf32> to vector<2x8x4xf32>
    %82 = vector.extract_strided_slice %40 {offsets = [0, 0, 20], sizes = [2, 8, 4], strides = [1, 1, 1]} : vector<2x8x32xf32> to vector<2x8x4xf32>
    %83 = vector.extract_strided_slice %40 {offsets = [0, 0, 24], sizes = [2, 8, 4], strides = [1, 1, 1]} : vector<2x8x32xf32> to vector<2x8x4xf32>
    %84 = vector.extract_strided_slice %40 {offsets = [0, 0, 28], sizes = [2, 8, 4], strides = [1, 1, 1]} : vector<2x8x32xf32> to vector<2x8x4xf32>
    %85 = vector.shape_cast %77 : vector<2x8x4xf32> to vector<2x1x8x4xf32>
    %86 = vector.shape_cast %78 : vector<2x8x4xf32> to vector<2x1x8x4xf32>
    %87 = vector.shape_cast %79 : vector<2x8x4xf32> to vector<2x1x8x4xf32>
    %88 = vector.shape_cast %80 : vector<2x8x4xf32> to vector<2x1x8x4xf32>
    %89 = vector.shape_cast %81 : vector<2x8x4xf32> to vector<2x1x8x4xf32>
    %90 = vector.shape_cast %82 : vector<2x8x4xf32> to vector<2x1x8x4xf32>
    %91 = vector.shape_cast %83 : vector<2x8x4xf32> to vector<2x1x8x4xf32>
    %92 = vector.shape_cast %84 : vector<2x8x4xf32> to vector<2x1x8x4xf32>
    %93 = tpu.concatenate %85, %86, %87, %88, %89, %90, %91, %92 in 1 : vector<2x1x8x4xf32>, vector<2x1x8x4xf32>, vector<2x1x8x4xf32>, vector<2x1x8x4xf32>, vector<2x1x8x4xf32>, vector<2x1x8x4xf32>, vector<2x1x8x4xf32>, vector<2x1x8x4xf32> -> vector<2x8x8x4xf32>
    %94 = vector.shape_cast %93 : vector<2x8x8x4xf32> to vector<16x8x4xf32>
    "tpu.trace_start"() <{level = 10 : i32, message = "bqd,bkd->bqk"}> : () -> ()
    %cst_18 = arith.constant dense<0.000000e+00> : vector<16x8x8xf32>
    %95 = tpu.matmul %58, %76, %cst_18 {dimension_numbers = #tpu.dot_dimension_numbers<[2], [2], [1], [1], [0, 0, 0, 1, 1, 1], [0], [0]>} : vector<16x8x4xf32>, vector<16x8x4xf32>, vector<16x8x8xf32> -> vector<16x8x8xf32>
    "tpu.trace_stop"() : () -> ()
    %c0_19 = arith.constant 0 : index
    %c0_20 = arith.constant 0 : index
    %c0_21 = arith.constant 0 : index
    %96 = vector.load %arg1[%c0_19, %c0_20, %c0_21] : memref<2x1x8xi32, #tpu.memory_space<vmem>>, vector<2x1x8xi32>
    %c0_i32 = arith.constant 0 : i32
    %97 = vector.broadcast %c0_i32 : i32 to vector<2x1x8xi32>
    %98 = arith.cmpi ne, %96, %97 : vector<2x1x8xi32>
    %99 = vector.shape_cast %98 : vector<2x1x8xi1> to vector<2x1x1x8xi1>
    %100 = vector.shape_cast %99 : vector<2x1x1x8xi1> to vector<2x1x1x8xi1>
    %101 = vector.broadcast %100 : vector<2x1x1x8xi1> to vector<2x8x1x8xi1>
    %102 = vector.shape_cast %101 : vector<2x8x1x8xi1> to vector<16x1x8xi1>
    %cst_22 = arith.constant -9.99999984E+17 : f32
    %103 = vector.shape_cast %102 : vector<16x1x8xi1> to vector<16x1x8xi1>
    %104 = vector.broadcast %103 : vector<16x1x8xi1> to vector<16x8x8xi1>
    %105 = vector.broadcast %cst_22 : f32 to vector<16x8x8xf32>
    %106 = arith.select %104, %105, %95 : vector<16x8x8xi1>, vector<16x8x8xf32>
    %cst_23 = arith.constant dense<0xFF800000> : vector<16x8xf32>
    %107 = vector.multi_reduction <maximumf>, %106, %cst_23 [2] : vector<16x8x8xf32> to vector<16x8xf32>
    %108 = vector.shape_cast %107 : vector<16x8xf32> to vector<16x8x1xf32>
    %109 = vector.broadcast %108 : vector<16x8x1xf32> to vector<16x8x8xf32>
    %110 = arith.subf %106, %109 : vector<16x8x8xf32>
    %111 = math.exp %110 : vector<16x8x8xf32>
    %cst_24 = arith.constant dense<0.000000e+00> : vector<16x8xf32>
    %112 = vector.multi_reduction <add>, %111, %cst_24 [2] : vector<16x8x8xf32> to vector<16x8xf32>
    %113 = vector.shape_cast %112 : vector<16x8xf32> to vector<16x8x1xf32>
    %114 = tpu.reciprocal %113 {approx = true} : vector<16x8x1xf32> -> vector<16x8x1xf32>
    %115 = vector.broadcast %114 : vector<16x8x1xf32> to vector<16x8x8xf32>
    %116 = arith.mulf %111, %115 : vector<16x8x8xf32>
    "tpu.trace_start"() <{level = 10 : i32, message = "bqk,bkd->bqd"}> : () -> ()
    %cst_25 = arith.constant dense<0.000000e+00> : vector<16x8x4xf32>
    %117 = tpu.matmul %116, %94, %cst_25 {dimension_numbers = #tpu.dot_dimension_numbers<[2], [1], [1], [2], [0, 0, 0, 1, 1, 2], [0], [0]>} : vector<16x8x8xf32>, vector<16x8x4xf32>, vector<16x8x4xf32> -> vector<16x8x4xf32>
    "tpu.trace_stop"() : () -> ()
    %118 = vector.shape_cast %117 : vector<16x8x4xf32> to vector<2x8x8x4xf32>
    %119 = vector.extract_strided_slice %118 {offsets = [0, 0, 0, 0], sizes = [2, 1, 8, 4], strides = [1, 1, 1, 1]} : vector<2x8x8x4xf32> to vector<2x1x8x4xf32>
    %120 = vector.shape_cast %119 : vector<2x1x8x4xf32> to vector<2x8x4xf32>
    %121 = vector.extract_strided_slice %118 {offsets = [0, 1, 0, 0], sizes = [2, 1, 8, 4], strides = [1, 1, 1, 1]} : vector<2x8x8x4xf32> to vector<2x1x8x4xf32>
    %122 = vector.shape_cast %121 : vector<2x1x8x4xf32> to vector<2x8x4xf32>
    %123 = vector.extract_strided_slice %118 {offsets = [0, 2, 0, 0], sizes = [2, 1, 8, 4], strides = [1, 1, 1, 1]} : vector<2x8x8x4xf32> to vector<2x1x8x4xf32>
    %124 = vector.shape_cast %123 : vector<2x1x8x4xf32> to vector<2x8x4xf32>
    %125 = vector.extract_strided_slice %118 {offsets = [0, 3, 0, 0], sizes = [2, 1, 8, 4], strides = [1, 1, 1, 1]} : vector<2x8x8x4xf32> to vector<2x1x8x4xf32>
    %126 = vector.shape_cast %125 : vector<2x1x8x4xf32> to vector<2x8x4xf32>
    %127 = vector.extract_strided_slice %118 {offsets = [0, 4, 0, 0], sizes = [2, 1, 8, 4], strides = [1, 1, 1, 1]} : vector<2x8x8x4xf32> to vector<2x1x8x4xf32>
    %128 = vector.shape_cast %127 : vector<2x1x8x4xf32> to vector<2x8x4xf32>
    %129 = vector.extract_strided_slice %118 {offsets = [0, 5, 0, 0], sizes = [2, 1, 8, 4], strides = [1, 1, 1, 1]} : vector<2x8x8x4xf32> to vector<2x1x8x4xf32>
    %130 = vector.shape_cast %129 : vector<2x1x8x4xf32> to vector<2x8x4xf32>
    %131 = vector.extract_strided_slice %118 {offsets = [0, 6, 0, 0], sizes = [2, 1, 8, 4], strides = [1, 1, 1, 1]} : vector<2x8x8x4xf32> to vector<2x1x8x4xf32>
    %132 = vector.shape_cast %131 : vector<2x1x8x4xf32> to vector<2x8x4xf32>
    %133 = vector.extract_strided_slice %118 {offsets = [0, 7, 0, 0], sizes = [2, 1, 8, 4], strides = [1, 1, 1, 1]} : vector<2x8x8x4xf32> to vector<2x1x8x4xf32>
    %134 = vector.shape_cast %133 : vector<2x1x8x4xf32> to vector<2x8x4xf32>
    %135 = tpu.concatenate %120, %122, %124, %126, %128, %130, %132, %134 in 2 : vector<2x8x4xf32>, vector<2x8x4xf32>, vector<2x8x4xf32>, vector<2x8x4xf32>, vector<2x8x4xf32>, vector<2x8x4xf32>, vector<2x8x4xf32>, vector<2x8x4xf32> -> vector<2x8x32xf32>
    %136 = vector.shape_cast %135 : vector<2x8x32xf32> to vector<16x32xf32>
    %c0_26 = arith.constant 0 : index
    %c0_27 = arith.constant 0 : index
    %137 = vector.load %arg4[%c0_26, %c0_27] : memref<32x32xf32, #tpu.memory_space<vmem>>, vector<32x32xf32>
    %cst_28 = arith.constant dense<0.000000e+00> : vector<16x32xf32>
    %138 = tpu.matmul %136, %137, %cst_28 {dimension_numbers = #tpu.dot_dimension_numbers<[1], [0], [0], [1], [0, 0, 1, 1], [], []>} : vector<16x32xf32>, vector<32x32xf32>, vector<16x32xf32> -> vector<16x32xf32>
    %139 = vector.broadcast %4 : vector<1x32xf32> to vector<16x32xf32>
    %140 = arith.addf %138, %139 : vector<16x32xf32>
    %141 = arith.addf %140, %7 : vector<16x32xf32>
    %cst_29 = arith.constant dense<0.000000e+00> : vector<16xf32>
    %142 = vector.multi_reduction <add>, %141, %cst_29 [1] : vector<16x32xf32> to vector<16xf32>
    %143 = vector.shape_cast %142 : vector<16xf32> to vector<16x1xf32>
    %cst_30 = arith.constant 3.200000e+01 : f32
    %144 = vector.broadcast %cst_30 : f32 to vector<16x1xf32>
    %145 = arith.divf %143, %144 : vector<16x1xf32>
    %146 = vector.broadcast %145 : vector<16x1xf32> to vector<16x32xf32>
    %147 = arith.subf %141, %146 : vector<16x32xf32>
    %148 = arith.mulf %147, %147 : vector<16x32xf32>
    %cst_31 = arith.constant dense<0.000000e+00> : vector<16xf32>
    %149 = vector.multi_reduction <add>, %148, %cst_31 [1] : vector<16x32xf32> to vector<16xf32>
    %150 = vector.shape_cast %149 : vector<16xf32> to vector<16x1xf32>
    %cst_32 = arith.constant 3.200000e+01 : f32
    %151 = vector.broadcast %cst_32 : f32 to vector<16x1xf32>
    %152 = arith.divf %150, %151 : vector<16x1xf32>
    %153 = vector.broadcast %145 : vector<16x1xf32> to vector<16x32xf32>
    %154 = arith.subf %141, %153 : vector<16x32xf32>
    %cst_33 = arith.constant 9.99999997E-7 : f32
    %155 = vector.broadcast %cst_33 : f32 to vector<16x1xf32>
    %156 = arith.addf %152, %155 : vector<16x1xf32>
    %157 = math.rsqrt %156 : vector<16x1xf32>
    %158 = vector.broadcast %157 : vector<16x1xf32> to vector<16x32xf32>
    %159 = arith.mulf %154, %158 : vector<16x32xf32>
    %160 = vector.broadcast %2 : vector<1x32xf32> to vector<16x32xf32>
    %161 = arith.mulf %159, %160 : vector<16x32xf32>
    %162 = vector.broadcast %3 : vector<1x32xf32> to vector<16x32xf32>
    %163 = arith.addf %161, %162 : vector<16x32xf32>
    %c0_34 = arith.constant 0 : index
    %c0_35 = arith.constant 0 : index
    %164 = vector.load %arg5[%c0_34, %c0_35] : memref<32x64xf32, #tpu.memory_space<vmem>>, vector<32x64xf32>
    %cst_36 = arith.constant dense<0.000000e+00> : vector<16x64xf32>
    %165 = tpu.matmul %163, %164, %cst_36 {dimension_numbers = #tpu.dot_dimension_numbers<[1], [0], [0], [1], [0, 0, 1, 1], [], []>} : vector<16x32xf32>, vector<32x64xf32>, vector<16x64xf32> -> vector<16x64xf32>
    %c0_37 = arith.constant 0 : index
    %c0_38 = arith.constant 0 : index
    %166 = vector.load %arg6[%c0_37, %c0_38] : memref<1x64xf32, #tpu.memory_space<vmem>>, vector<1x64xf32>
    %167 = vector.broadcast %166 : vector<1x64xf32> to vector<16x64xf32>
    %168 = arith.addf %165, %167 : vector<16x64xf32>
    %cst_39 = arith.constant 0.000000e+00 : f32
    %169 = vector.broadcast %cst_39 : f32 to vector<16x64xf32>
    %170 = arith.maximumf %168, %169 : vector<16x64xf32>
    %c0_40 = arith.constant 0 : index
    %c0_41 = arith.constant 0 : index
    %171 = vector.load %arg7[%c0_40, %c0_41] : memref<64x32xf32, #tpu.memory_space<vmem>>, vector<64x32xf32>
    %cst_42 = arith.constant dense<0.000000e+00> : vector<16x32xf32>
    %172 = tpu.matmul %170, %171, %cst_42 {dimension_numbers = #tpu.dot_dimension_numbers<[1], [0], [0], [1], [0, 0, 1, 1], [], []>} : vector<16x64xf32>, vector<64x32xf32>, vector<16x32xf32> -> vector<16x32xf32>
    %173 = vector.broadcast %5 : vector<1x32xf32> to vector<16x32xf32>
    %174 = arith.addf %172, %173 : vector<16x32xf32>
    %175 = arith.addf %174, %141 : vector<16x32xf32>
    %176 = vector.shape_cast %175 : vector<16x32xf32> to vector<2x8x32xf32>
    %c0_43 = arith.constant 0 : index
    %c0_44 = arith.constant 0 : index
    %c0_45 = arith.constant 0 : index
    %177 = vector.load %arg9[%c0_43, %c0_44, %c0_45] : memref<2x8x32xf32, #tpu.memory_space<vmem>>, vector<2x8x32xf32>
    tpu.vector_store %arg9[%c0_43, %c0_44, %c0_45], %176 {strides = array<i32>} : memref<2x8x32xf32, #tpu.memory_space<vmem>>, vector<2x8x32xf32>,
    %178 = vector.shape_cast %116 : vector<16x8x8xf32> to vector<2x8x8x8xf32>
    %cst_46 = arith.constant dense<0.000000e+00> : vector<8x8x8xf32>
    %179 = vector.multi_reduction <add>, %178, %cst_46 [0] : vector<2x8x8x8xf32> to vector<8x8x8xf32>
    %cst_47 = arith.constant 1.250000e-01 : f32
    %180 = vector.broadcast %cst_47 : f32 to vector<8x8x8xf32>
    %181 = arith.mulf %179, %180 : vector<8x8x8xf32>
    %c0_48 = arith.constant 0 : index
    %c0_49 = arith.constant 0 : index
    %c0_50 = arith.constant 0 : index
    %182 = vector.load %arg10[%c0_48, %c0_49, %c0_50] : memref<8x8x8xf32, #tpu.memory_space<vmem>>, vector<8x8x8xf32>
    tpu.vector_store %arg10[%c0_48, %c0_49, %c0_50], %181 {strides = array<i32>} : memref<8x8x8xf32, #tpu.memory_space<vmem>>, vector<8x8x8xf32>,
    return
  }
}

</mosaic_0001>

<bundles_post_ra>
// kernel: tpu_custom_call.1
= control target key start
LH: loop header
LB: loop body
LE: loop exit
PB: predicated region body
PF: predicated region fallthrough
CT: control target
= control target key end

     0   :  { %16 = vsyncpa [#allocation3], 0  ;;  %s4687_s0 = inlined_call_operand.hbm [shape: f32[2,8,32], index: 0, kind: input, shape index: {}]   ;;  %s4688_s1 = inlined_call_operand.vmem [shape: s32[2,1,8], index: 1, kind: input, shape index: {}]   ;;  %s4689_s2 = inlined_call_operand.vmem [shape: f32[32,96], index: 2, kind: input, shape index: {}]   ;;  %s4690_s3 = inlined_call_operand.vmem [shape: f32[1,96], index: 3, kind: input, shape index: {}]   ;;  %s4691_s4 = inlined_call_operand.vmem [shape: f32[32,32], index: 4, kind: input, shape index: {}]   ;;  %s4692_s5 = inlined_call_operand.vmem [shape: f32[32,64], index: 5, kind: input, shape index: {}]   ;;  %s4693_s6 = inlined_call_operand.vmem [shape: f32[1,64], index: 6, kind: input, shape index: {}]   ;;  %s4694_s7 = inlined_call_operand.vmem [shape: f32[64,32], index: 7, kind: input, shape index: {}]   ;;  %s4695_s8 = inlined_call_operand.vmem [shape: f32[8,32], index: 8, kind: input, shape index: {}]   ;;  %s4696_s9 = inlined_call_operand.hbm [shape: f32[2,8,32], index: 9, kind: output, shape index: {0}]   ;;  %s4697_s10 = inlined_call_operand.hbm [shape: f32[8,8,8], index: 10, kind: output, shape index: {1}]  }
   0x1   :  { %17 = vsyncpa [#allocation4], 0 }
   0x2   :  { %18 = vsyncpa [#allocation7], 0  ;;  %s3912_s13 = smov [#allocation2]   ;;  %s3840_s17 = scalar_lea.hbm %s4687_s0, 256 }
   0x3   :  { %s24_s14 = sshll.u32 %s3912_s13, 4  ;;  %p3841_p0 = scmp.ne.s32.totalorder %s4687_s0, %s3840_s17  ;;  %s25_s14 = int_to_ptr.vmem [resolvable:$true] %s24_s14 }
   0x4   :  { %p3844_p1 = scmp.lt.u32.totalorder %s3840_s17, %s4687_s0 }
   0x6   :  { %p3846_p2 = pnand %p3844_p1, %p3841_p0 }
   0x8   :  { %3849 = shalt.err (!%p3846_p2)
}
   0x9   :  { %s3850_s22 = scalar_lea.vmem %s25_s14, 256  ;;  %p3855_p4 = scmp.lt.s32.totalorder %s25_s14, %s25_s14 }
   0xa   :  { %p3851_p3 = scmp.ne.s32.totalorder %s25_s14, %s3850_s22  ;;  %p3856_p5 = scmp.lt.s32.totalorder %s3850_s22, %s3850_s22 }
   0xc   :  { %p3857_p6 = por %p3856_p5, %p3855_p4 }
   0xe   :  { %p3858_p7 = pnand %p3857_p6, %p3851_p3 }
  0x10   :  { %3861 = shalt.err (!%p3858_p7)
}
  0x11   :  { %s3913_s23 = smov 128   ;;  %s3914_s24 = smov 8  }
  0x12   :  { %30 = dma.hbm_to_vmem [thread:$0]  %s4687_s0, 256, %s25_s14, [#allocation3], %s3913_s23, %s3913_s23, %s3914_s24  }
  0x13   :  { %3906 = dma.done.wait [#allocation3], 256  }
  0x14   :  { %3907 = vsyncadd [#allocation3], 4294967040  ;;  %vm58_vm0 = vcmask 261120   ;;  %v56_v0 = vld [vmem:[#allocation2] sm:$0xff]  ;;  %v57_v1 = vld [vmem:[#allocation2 + $0x8] sm:$0xff]  ;;  %s3915_s19 = smov 120  }
  0x15   :  { %v59_v2 = vsel %vm58_vm0, %v56_v0, 0.0  ;;  %v62_v3 = vsel %vm58_vm0, %v57_v1, 0.0  ;;  %v98_v14 = vld [vmem:[%s4689_s2] sm:$0xff]  ;;  %v99_v15 = vld [vmem:[%s4689_s2 + $0x8] sm:$0xff]  ;;  %v100_v16 = vld [vmem:[%s4689_s2 + $0x10] sm:$0xff]  ;;  %s3916_s20 = smov 124  }
  0x16   :  { %60 = vadd.xlane.f32.xlu0 %v59_v2  ;;  %v3703_v17 = vpack.c.bf16 %v99_v15, %v98_v14  ;;  %v101_v18 = vld [vmem:[%s4689_s2 + $0x18] sm:$0xff]  ;;  %v3335_v27 = vld [vmem:[%s4695_s8] ss:$0 sm:$0xff]  ;;  %v3336_v29 = vld [vmem:[%s4695_s8 + $0x1] ss:$0 sm:$0xff]  ;;  %s3917_s21 = smov 116  }
  0x17   :  { %v3707_v19 = vpack.c.bf16 %v101_v18, %v100_v16  ;;  %v3337_v36 = vld [vmem:[%s4690_s3] ss:$0 sm:$0xff]  ;;  %s3918_s22 = smov 108   ;;  %s3919_s25 = smov 112   ;;  %v3921_v40 = vmov 0.0   ;;  %vm3923_vm1 = vmmov 0  }
  0x18   :  { %3704 = vmatprep.subr.bf16.mxu1 %v3703_v17  ;;  %s3920_s3 = smov 100   ;;  %3512 = vmatprep.subr.mxu0 %v3921_v40  ;;  %s3922_s26 = smov 104   ;;  %vm222_vm2 = vcmask 31744   ;;  %v3926_v15 = vmov 0   ;;  %vm1473_vm5 = vcmask 64512   ;;  %vm2926_vm8 = vcmask 97280  }
  0x19   :  { %3706 = vmatpush3.bf16.msra.mxu1 %v3703_v17  ;;  %3514 = vmatprep.mubr.msk.f32.mxu0 %vm3923_vm1, %v3921_v40  ;;  %s3924_s0 = smov 96   ;;  %s3925_s27 = smov 64   ;;  %vm2929_vm9 = vcmask 130048   ;;  %vm2932_vm10 = vcmask 162816   ;;  %vm2935_vm11 = vcmask 195584   ;;  %vm2938_vm12 = vcmask 228352  }
  0x1a   :  { %63 = vadd.xlane.f32.xlu0 %v62_v3  ;;  %3708 = vmatprep.subr.bf16.mxu1 %v3707_v19  ;;  %s3928_s12 = smov 12   ;;  %s3929_s13 = smov 16   ;;  %vm3176_vm13 = vcmask 523264  }
  0x1b   :  { %s3930_s14 = smov 20   ;;  %s3931_s15 = smov 24  }
  0x1c   :  { %s3932_s2 = smov 28   ;;  %s3933_s11 = smov [#allocation6]  }
  0x1d   :  { %3710 = vmatpush3.bf16.msra.mxu1 %v3707_v19 }
  0x1e   :  { %3502 = vmatprep.subr.mxu1 %v3921_v40 }
  0xa3   :  { %v61_v4 = vpop.xlane.xlu0 %60 }
  0xa4   :  { %v66_v5 = vmul.f32 0.03125, %v61_v4 }
  0xa6   :  { %v68_v6 = vsub.f32 %v56_v0, %v66_v5 }
  0xa7   :  { %v64_v7 = vpop.xlane.xlu0 %63 }
  0xa8   :  { %v67_v8 = vmul.f32 0.03125, %v64_v7  ;;  %v70_v9 = vmul.f32 %v68_v6, %v68_v6 }
  0xaa   :  { %v69_v10 = vsub.f32 %v57_v1, %v67_v8  ;;  %v72_v11 = vsel %vm58_vm0, %v70_v9, 0.0 }
  0xab   :  { %73 = vadd.xlane.f32.xlu1 %v72_v11  ;;  %v1447_v11 = vlaneseq }
  0xac   :  { %v71_v12 = vmul.f32 %v69_v10, %v69_v10 }
  0xae   :  { %v75_v13 = vsel %vm58_vm0, %v71_v12, 0.0  ;;  %v1437_v12 = vld [vmem:[%s4688_s1] sm:$0x1] }
  0xaf   :  { %76 = vadd.xlane.f32.xlu1 %v75_v13  ;;  %v1448_v13 = vshrl.u32 %v1447_v11, 7  ;;  %vm1439_vm3 = vcmp.ne.s32.totalorder %v1437_v12, 0 }
  0xb0   :  { %v1445_v16 = vsel %vm1439_vm3, 1, %v3926_v15 }
  0xb1   :  { %v1449_v14 = vsub.s32 0, %v1448_v13 }
  0xb3   :  { %v1450_v17 = vrot.slane %v1445_v16, %v1449_v14 }
  0xb5   :  { %vm1455_vm4 = vcmp.eq.s32.totalorder %v1450_v17, 1 }
 0x138   :  { %v74_v20 = vpop.xlane.xlu1 %73 }
 0x139   :  { %v78_v21 = vmul.f32 0.03125, %v74_v20 }
 0x13b   :  { %v80_v22 = vadd.f32 1e-06, %v78_v21 }
 0x13c   :  { %v77_v23 = vpop.xlane.xlu1 %76 }
 0x13d   :  { %3766 = vrsqrt.f32 %v80_v22  ;;  %v79_v24 = vmul.f32 0.03125, %v77_v23 }
 0x13f   :  { %v81_v25 = vadd.f32 1e-06, %v79_v24  ;;  %v1438_v24 = vld [vmem:[%s4688_s1 + $0x1] sm:$0x1]  ;;  %s3927_s1 = smov 4  }
 0x140   :  { %vm1440_vm6 = vcmp.ne.s32.totalorder %v1438_v24, 0 }
 0x141   :  { %3768 = vrsqrt.f32 %v81_v25 }
 0x147   :  { %v3767_v26 = vpop.eup %3766 }
 0x148   :  { %v84_v28 = vmul.f32 %v3767_v26, %v68_v6 }
 0x14a   :  { %v90_v30 = vmul.f32 %v3335_v27, %v84_v28 }
 0x14b   :  { %v3769_v31 = vpop.eup %3768 }
 0x14c   :  { %v85_v32 = vmul.f32 %v3769_v31, %v69_v10  ;;  %v96_v33 = vadd.f32 %v3336_v29, %v90_v30 }
 0x14e   :  { %v91_v34 = vmul.f32 %v3335_v27, %v85_v32  ;;  %3499 = vmatprep.mubr.msk.f32.mxu1 %vm58_vm0, %v96_v33 }
 0x150   :  { %v97_v35 = vadd.f32 %v3336_v29, %v91_v34 }
 0x152   :  { %3500 = vmatmul.mubr.msk.f32.vlgmr.msra.gmra.mrb[0].mxu1 %vm58_vm0, %v97_v35  ;;  %v1446_v35 = vsel %vm1440_vm6, 1, %v3926_v15 }
 0x153   :  { %3504 = vmatprep.mubr.msk.f32.mxu1 %vm3923_vm1, %v3921_v40 }
 0x225   :  { %v3501_v37 = vpop.f32.mrb[0].mxu1 }
 0x226   :  { %v181_v38 = vpop.f32.mrb[1].mxu1  ;;  %v4042_v41 = vadd.f32 %v3501_v37, %v3337_v36 }
 0x227   :  { %v4032_v39 = vadd.f32 %v3337_v36, %v181_v38 }
 0x229   :  { %196 = vrot.lane.b32.xlu1 %v4032_v39, %s3915_s19  ;;  %192 = vrot.lane.b32.xlu0 %v4032_v39, %s3916_s20 }
 0x22d   :  { %200 = vrot.lane.b32.xlu1 %v4032_v39, %s3917_s21  ;;  %208 = vrot.lane.b32.xlu0 %v4032_v39, %s3918_s22 }
 0x231   :  { %204 = vrot.lane.b32.xlu1 %v4032_v39, %s3919_s25  ;;  %216 = vrot.lane.b32.xlu0 %v4032_v39, %s3920_s3 }
 0x235   :  { %212 = vrot.lane.b32.xlu1 %v4032_v39, %s3922_s26  ;;  %198 = vrot.lane.b32.xlu0 %v4042_v41, %s3915_s19 }
 0x239   :  { %194 = vrot.lane.b32.xlu1 %v4042_v41, %s3916_s20  ;;  %206 = vrot.lane.b32.xlu0 %v4042_v41, %s3919_s25 }
 0x23d   :  { %202 = vrot.lane.b32.xlu1 %v4042_v41, %s3917_s21  ;;  %214 = vrot.lane.b32.xlu0 %v4042_v41, %s3922_s26 }
 0x241   :  { %210 = vrot.lane.b32.xlu1 %v4042_v41, %s3918_s22  ;;  %220 = vrot.lane.b32.xlu0 %v4032_v39, %s3924_s0 }
 0x245   :  { %218 = vrot.lane.b32.xlu1 %v4042_v41, %s3920_s3 }
 0x29b   :  { %v197_v42 = vpop.permute.xlu1 %196  ;;  %v193_v43 = vpop.permute.xlu0 %192 }
 0x29c   :  { %373 = vrot.lane.b32.xlu0 %v197_v42, %s3924_s0  ;;  %297 = vrot.lane.b32.xlu1 %v193_v43, %s3924_s0 }
 0x29f   :  { %v201_v44 = vpop.permute.xlu1 %200  ;;  %v4060_v45 = vpop.permute.xlu0 %208 }
 0x2a0   :  { %449 = vrot.lane.b32.xlu1 %v201_v44, %s3924_s0 }
 0x2a3   :  { %v205_v46 = vpop.permute.xlu1 %204  ;;  %v4063_v47 = vpop.permute.xlu0 %216 }
 0x2a4   :  { %525 = vrot.lane.b32.xlu0 %v205_v46, %s3924_s0  ;;  %601 = vrot.lane.b32.xlu1 %v4060_v45, %s3924_s0 }
 0x2a7   :  { %v4068_v48 = vpop.permute.xlu1 %212  ;;  %v4070_v49 = vpop.permute.xlu0 %198 }
 0x2a8   :  { %677 = vrot.lane.b32.xlu0 %v4068_v48, %s3924_s0  ;;  %753 = vrot.lane.b32.xlu1 %v4063_v47, %s3924_s0 }
 0x2ab   :  { %v4076_v50 = vpop.permute.xlu1 %194  ;;  %v4078_v51 = vpop.permute.xlu0 %206 }
 0x2ac   :  { %829 = vrot.lane.b32.xlu0 %v4042_v41, %s3924_s0  ;;  %905 = vrot.lane.b32.xlu1 %v4076_v50, %s3924_s0 }
 0x2af   :  { %v4084_v52 = vpop.permute.xlu1 %202  ;;  %v4086_v53 = vpop.permute.xlu0 %214 }
 0x2b0   :  { %1057 = vrot.lane.b32.xlu1 %v4084_v52, %s3924_s0  ;;  %981 = vrot.lane.b32.xlu0 %v4070_v49, %s3924_s0 }
 0x2b3   :  { %v4092_v54 = vpop.permute.xlu1 %210  ;;  %v221_v55 = vpop.permute.xlu0 %220 }
 0x2b4   :  { %1209 = vrot.lane.b32.xlu1 %v4092_v54, %s3924_s0  ;;  %1133 = vrot.lane.b32.xlu0 %v4078_v51, %s3924_s0 }
 0x2b5   :  { %3503 = vmatpush3.xpose.msk.msra.mxu1 %vm222_vm2, %v221_v55 }
 0x2b6   :  { %3507 = vmatprep.subr.mxu1 %v3921_v40 }
 0x2b7   :  { %v4100_v56 = vpop.permute.xlu1 %218 }
 0x2b8   :  { %3505 = vmatmul.mubr.msk.f32.vlgmr.msra.gmra.mrb[2].mxu1 %vm222_vm2, %v4032_v39  ;;  %1361 = vrot.lane.b32.xlu1 %v4100_v56, %s3924_s0 }
 0x2b9   :  { %1285 = vrot.lane.b32.xlu0 %v4086_v53, %s3924_s0  ;;  %3509 = vmatprep.mubr.msk.f32.mxu1 %vm3923_vm1, %v3921_v40 }
 0x2bc   :  { %2334 = vrot.lane.b32.xlu1 %v4076_v50, %s3925_s27 }
 0x2bd   :  { %1650 = vrot.lane.b32.xlu0 %v4032_v39, %s3925_s27 }
 0x2c0   :  { %1726 = vrot.lane.b32.xlu1 %v193_v43, %s3925_s27 }
 0x2c1   :  { %2258 = vrot.lane.b32.xlu0 %v4042_v41, %s3925_s27 }
 0x2c4   :  { %1878 = vrot.lane.b32.xlu1 %v201_v44, %s3925_s27 }
 0x2c5   :  { %1802 = vrot.lane.b32.xlu0 %v197_v42, %s3925_s27 }
 0x2c8   :  { %1954 = vrot.lane.b32.xlu1 %v205_v46, %s3925_s27 }
 0x2c9   :  { %2106 = vrot.lane.b32.xlu0 %v4068_v48, %s3925_s27 }
 0x2cc   :  { %2030 = vrot.lane.b32.xlu1 %v4060_v45, %s3925_s27 }
 0x2d0   :  { %2182 = vrot.lane.b32.xlu1 %v4063_v47, %s3925_s27 }
 0x30e   :  { %v298_v57 = vpop.permute.xlu1 %297  ;;  %v374_v58 = vpop.permute.xlu0 %373 }
 0x30f   :  { %3508 = vmatpush3.xpose.msk.msra.mxu1 %vm222_vm2, %v298_v57  ;;  %3513 = vmatpush3.xpose.msk.msra.mxu0 %vm222_vm2, %v374_v58 }
 0x310   :  { %3517 = vmatprep.subr.mxu1 %v3921_v40  ;;  %3522 = vmatprep.subr.mxu0 %v3921_v40 }
 0x312   :  { %v450_v59 = vpop.permute.xlu1 %449  ;;  %3510 = vmatmul.mubr.msk.f32.vlgmr.msra.gmra.mrb[4].mxu1 %vm222_vm2, %v193_v43  ;;  %3515 = vmatmul.mubr.msk.f32.vlgmr.msra.gmra.mrb[0].mxu0 %vm222_vm2, %v197_v42 }
 0x313   :  { %3518 = vmatpush3.xpose.msk.msra.mxu1 %vm222_vm2, %v450_v59  ;;  %3519 = vmatprep.mubr.msk.f32.mxu1 %vm3923_vm1, %v3921_v40 }
 0x314   :  { %3527 = vmatprep.subr.mxu1 %v3921_v40  ;;  %3524 = vmatprep.mubr.msk.f32.mxu0 %vm3923_vm1, %v3921_v40 }
 0x316   :  { %v602_v60 = vpop.permute.xlu1 %601  ;;  %3520 = vmatmul.mubr.msk.f32.vlgmr.msra.gmra.mrb[6].mxu1 %vm222_vm2, %v201_v44  ;;  %v526_v61 = vpop.permute.xlu0 %525 }
 0x317   :  { %3523 = vmatpush3.xpose.msk.msra.mxu0 %vm222_vm2, %v526_v61  ;;  %3528 = vmatpush3.xpose.msk.msra.mxu1 %vm222_vm2, %v602_v60 }
 0x318   :  { %3529 = vmatprep.mubr.msk.f32.mxu1 %vm3923_vm1, %v3921_v40  ;;  %3532 = vmatprep.subr.mxu0 %v3921_v40 }
 0x319   :  { %3537 = vmatprep.subr.mxu1 %v3921_v40 }
 0x31a   :  { %v754_v62 = vpop.permute.xlu1 %753  ;;  %3525 = vmatmul.mubr.msk.f32.vlgmr.msra.gmra.mrb[2].mxu0 %vm222_vm2, %v205_v46  ;;  %3530 = vmatmul.mubr.msk.f32.vlgmr.msra.gmra.mrb[8].mxu1 %vm222_vm2, %v4060_v45  ;;  %v678_v63 = vpop.permute.xlu0 %677  ;;  %v1454_v45 = vrot.slane %v1446_v35, %v1449_v14 }
 0x31b   :  { %3533 = vmatpush3.xpose.msk.msra.mxu0 %vm222_vm2, %v678_v63  ;;  %3538 = vmatpush3.xpose.msk.msra.mxu1 %vm222_vm2, %v754_v62 }
 0x31c   :  { %3534 = vmatprep.mubr.msk.f32.mxu0 %vm3923_vm1, %v3921_v40  ;;  %3539 = vmatprep.mubr.msk.f32.mxu1 %vm3923_vm1, %v3921_v40  ;;  %vm1456_vm7 = vcmp.eq.s32.totalorder %v1454_v45, 1 }
 0x31d   :  { %3542 = vmatprep.subr.mxu0 %v3921_v40  ;;  %3547 = vmatprep.subr.mxu1 %v3921_v40 }
 0x31e   :  { %v906_v0 = vpop.permute.xlu1 %905  ;;  %3535 = vmatmul.mubr.msk.f32.vlgmr.msra.gmra.mrb[4].mxu0 %vm222_vm2, %v4068_v48  ;;  %3540 = vmatmul.mubr.msk.f32.vlgmr.msra.gmra.mrb[10].mxu1 %vm222_vm2, %v4063_v47  ;;  %v830_v1 = vpop.permute.xlu0 %829 }
 0x31f   :  { %3543 = vmatpush3.xpose.msk.msra.mxu0 %vm222_vm2, %v830_v1  ;;  %3548 = vmatpush3.xpose.msk.msra.mxu1 %vm222_vm2, %v906_v0 }
 0x320   :  { %3544 = vmatprep.mubr.msk.f32.mxu0 %vm3923_vm1, %v3921_v40  ;;  %3549 = vmatprep.mubr.msk.f32.mxu1 %vm3923_vm1, %v3921_v40 }
 0x321   :  { %3552 = vmatprep.subr.mxu0 %v3921_v40  ;;  %3557 = vmatprep.subr.mxu1 %v3921_v40 }
 0x322   :  { %v1058_v2 = vpop.permute.xlu1 %1057  ;;  %3545 = vmatmul.mubr.msk.f32.vlgmr.msra.gmra.mrb[6].mxu0 %vm222_vm2, %v4042_v41  ;;  %3550 = vmatmul.mubr.msk.f32.vlgmr.msra.gmra.mrb[12].mxu1 %vm222_vm2, %v4076_v50  ;;  %v982_v3 = vpop.permute.xlu0 %981 }
 0x323   :  { %3553 = vmatpush3.xpose.msk.msra.mxu0 %vm222_vm2, %v982_v3  ;;  %3558 = vmatpush3.xpose.msk.msra.mxu1 %vm222_vm2, %v1058_v2 }
 0x324   :  { %3554 = vmatprep.mubr.msk.f32.mxu0 %vm3923_vm1, %v3921_v40  ;;  %3559 = vmatprep.mubr.msk.f32.mxu1 %vm3923_vm1, %v3921_v40 }
 0x325   :  { %3562 = vmatprep.subr.mxu0 %v3921_v40  ;;  %3567 = vmatprep.subr.mxu1 %v3921_v40 }
 0x326   :  { %v1210_v4 = vpop.permute.xlu1 %1209  ;;  %3555 = vmatmul.mubr.msk.f32.vlgmr.msra.gmra.mrb[8].mxu0 %vm222_vm2, %v4070_v49  ;;  %3560 = vmatmul.mubr.msk.f32.vlgmr.msra.gmra.mrb[14].mxu1 %vm222_vm2, %v4084_v52  ;;  %v1134_v5 = vpop.permute.xlu0 %1133 }
 0x327   :  { %3563 = vmatpush3.xpose.msk.msra.mxu0 %vm222_vm2, %v1134_v5  ;;  %3568 = vmatpush3.xpose.msk.msra.mxu1 %vm222_vm2, %v1210_v4 }
 0x328   :  { %3564 = vmatprep.mubr.msk.f32.mxu0 %vm3923_vm1, %v3921_v40  ;;  %3569 = vmatprep.mubr.msk.f32.mxu1 %vm3923_vm1, %v3921_v40 }
 0x329   :  { %3572 = vmatprep.subr.mxu0 %v3921_v40  ;;  %3577 = vmatprep.subr.mxu1 %v3921_v40 }
 0x32a   :  { %v1362_v6 = vpop.permute.xlu1 %1361  ;;  %3565 = vmatmul.mubr.msk.f32.vlgmr.msra.gmra.mrb[10].mxu0 %vm222_vm2, %v4078_v51  ;;  %3570 = vmatmul.mubr.msk.f32.vlgmr.msra.gmra.mrb[16].mxu1 %vm222_vm2, %v4092_v54 }
 0x32b   :  { %v1286_v7 = vpop.permute.xlu0 %1285  ;;  %3578 = vmatpush3.xpose.msk.msra.mxu1 %vm222_vm2, %v1362_v6  ;;  %3574 = vmatprep.mubr.msk.f32.mxu0 %vm3923_vm1, %v3921_v40 }
 0x32c   :  { %3573 = vmatpush3.xpose.msk.msra.mxu0 %vm222_vm2, %v1286_v7  ;;  %3579 = vmatprep.mubr.msk.f32.mxu1 %vm3923_vm1, %v3921_v40 }
 0x32d   :  { %3582 = vmatprep.subr.mxu0 %v3921_v40  ;;  %3587 = vmatprep.subr.mxu1 %v3921_v40 }
 0x32e   :  { %v4204_v8 = vpop.permute.xlu1 %2334  ;;  %3580 = vmatmul.mubr.msk.f32.vlgmr.msra.gmra.mrb[18].mxu1 %vm222_vm2, %v4100_v56 }
 0x32f   :  { %3575 = vmatmul.mubr.msk.f32.vlgmr.msra.gmra.mrb[12].mxu0 %vm222_vm2, %v4086_v53  ;;  %v1651_v9 = vpop.permute.xlu0 %1650  ;;  %3589 = vmatprep.mubr.msk.f32.mxu1 %vm3923_vm1, %v3921_v40 }
 0x330   :  { %3583 = vmatpush3.msra.mxu0 %v1651_v9  ;;  %3584 = vmatprep.mubr.msk.f32.mxu0 %vm3923_vm1, %v3921_v40 }
 0x331   :  { %3592 = vmatprep.subr.mxu0 %v3921_v40 }
 0x332   :  { %v1727_v10 = vpop.permute.xlu1 %1726 }
 0x333   :  { %3588 = vmatpush3.msra.mxu1 %v1727_v10 }
 0x334   :  { %3597 = vmatprep.subr.mxu1 %v3921_v40 }
 0x38b   :  { %v293_v18 = vpop.f32.mrb[2].mxu1 }
 0x38c   :  { %v4220_v19 = vsel %vm1455_vm4, -1e+18, %v293_v18  ;;  %v3506_v20 = vpop.f32.mrb[3].mxu1 }
 0x38d   :  { %v1474_v21 = vsel %vm1473_vm5, %v4220_v19, -inf }
 0x38e   :  { %1475 = vmax.xlane.f32.xlu0 %v1474_v21 }
 0x3e5   :  { %v369_v22 = vpop.f32.mrb[4].mxu1  ;;  %v445_v23 = vpop.f32.mrb[0].mxu0 }
 0x3e6   :  { %v4228_v25 = vsel %vm1455_vm4, -1e+18, %v369_v22  ;;  %v4231_v26 = vsel %vm1455_vm4, -1e+18, %v445_v23  ;;  %v3511_v27 = vpop.f32.mrb[5].mxu1  ;;  %v3516_v28 = vpop.f32.mrb[1].mxu0 }
 0x3e7   :  { %v1477_v29 = vsel %vm1473_vm5, %v4228_v25, -inf  ;;  %v1480_v30 = vsel %vm1473_vm5, %v4231_v26, -inf }
 0x3e8   :  { %1478 = vmax.xlane.f32.xlu1 %v1477_v29  ;;  %1481 = vmax.xlane.f32.xlu0 %v1480_v30  ;;  %v4299_v30 = vpop.permute.xlu0 %2258 }
 0x3e9   :  { %v521_v31 = vpop.f32.mrb[6].mxu1 }
 0x3ea   :  { %v4238_v32 = vsel %vm1455_vm4, -1e+18, %v521_v31  ;;  %v3521_v33 = vpop.f32.mrb[7].mxu1 }
 0x3eb   :  { %v1483_v34 = vsel %vm1473_vm5, %v4238_v32, -inf }
 0x3ec   :  { %1484 = vmax.xlane.f32.xlu0 %v1483_v34  ;;  %v4301_v31 = vpop.permute.xlu0 %1802 }
 0x3ed   :  { %v597_v36 = vpop.f32.mrb[2].mxu0  ;;  %v673_v37 = vpop.f32.mrb[8].mxu1 }
 0x3ee   :  { %v4243_v38 = vsel %vm1455_vm4, -1e+18, %v597_v36  ;;  %v4246_v39 = vsel %vm1455_vm4, -1e+18, %v673_v37  ;;  %v3526_v41 = vpop.f32.mrb[3].mxu0  ;;  %v3531_v42 = vpop.f32.mrb[9].mxu1 }
 0x3ef   :  { %v1489_v43 = vsel %vm1473_vm5, %v4246_v39, -inf  ;;  %v1486_v44 = vsel %vm1473_vm5, %v4243_v38, -inf }
 0x3f0   :  { %1490 = vmax.xlane.f32.xlu1 %v1489_v43  ;;  %1487 = vmax.xlane.f32.xlu0 %v1486_v44  ;;  %v4307_v33 = vpop.permute.xlu0 %2106 }
 0x3f1   :  { %v749_v46 = vpop.f32.mrb[4].mxu0  ;;  %v825_v47 = vpop.f32.mrb[10].mxu1 }
 0x3f2   :  { %v4253_v48 = vsel %vm1455_vm4, -1e+18, %v749_v46  ;;  %v4256_v50 = vsel %vm1455_vm4, -1e+18, %v825_v47  ;;  %v3536_v55 = vpop.f32.mrb[5].mxu0  ;;  %v3541_v57 = vpop.f32.mrb[11].mxu1 }
 0x3f3   :  { %v1495_v58 = vsel %vm1473_vm5, %v4256_v50, -inf  ;;  %v1492_v59 = vsel %vm1473_vm5, %v4253_v48, -inf }
 0x3f4   :  { %1496 = vmax.xlane.f32.xlu1 %v1495_v58  ;;  %1493 = vmax.xlane.f32.xlu0 %v1492_v59 }
 0x3f5   :  { %v901_v60 = vpop.f32.mrb[6].mxu0  ;;  %v977_v61 = vpop.f32.mrb[12].mxu1 }
 0x3f6   :  { %v4263_v62 = vsel %vm1456_vm7, -1e+18, %v901_v60  ;;  %v4266_v63 = vsel %vm1456_vm7, -1e+18, %v977_v61  ;;  %v3546_v0 = vpop.f32.mrb[7].mxu0  ;;  %v3551_v1 = vpop.f32.mrb[13].mxu1 }
 0x3f7   :  { %v1501_v2 = vsel %vm1473_vm5, %v4266_v63, -inf  ;;  %v1498_v3 = vsel %vm1473_vm5, %v4263_v62, -inf }
 0x3f8   :  { %1502 = vmax.xlane.f32.xlu1 %v1501_v2  ;;  %1499 = vmax.xlane.f32.xlu0 %v1498_v3 }
 0x3f9   :  { %v1053_v4 = vpop.f32.mrb[8].mxu0  ;;  %v1129_v5 = vpop.f32.mrb[14].mxu1 }
 0x3fa   :  { %v4273_v6 = vsel %vm1456_vm7, -1e+18, %v1053_v4  ;;  %v4276_v7 = vsel %vm1456_vm7, -1e+18, %v1129_v5  ;;  %v3556_v9 = vpop.f32.mrb[9].mxu0  ;;  %v3561_v10 = vpop.f32.mrb[15].mxu1 }
 0x3fb   :  { %v1507_v11 = vsel %vm1473_vm5, %v4276_v7, -inf  ;;  %v1504_v12 = vsel %vm1473_vm5, %v4273_v6, -inf }
 0x3fc   :  { %1508 = vmax.xlane.f32.xlu1 %v1507_v11  ;;  %1505 = vmax.xlane.f32.xlu0 %v1504_v12 }
 0x3fd   :  { %v1205_v13 = vpop.f32.mrb[10].mxu0  ;;  %v1281_v14 = vpop.f32.mrb[16].mxu1 }
 0x3fe   :  { %v4283_v15 = vsel %vm1456_vm7, -1e+18, %v1205_v13  ;;  %v4286_v16 = vsel %vm1456_vm7, -1e+18, %v1281_v14  ;;  %v3566_v17 = vpop.f32.mrb[11].mxu0  ;;  %v3571_v18 = vpop.f32.mrb[17].mxu1 }
 0x3ff   :  { %v1513_v20 = vsel %vm1473_vm5, %v4286_v16, -inf  ;;  %v1510_v21 = vsel %vm1473_vm5, %v4283_v15, -inf }
 0x400   :  { %1514 = vmax.xlane.f32.xlu1 %v1513_v20  ;;  %1511 = vmax.xlane.f32.xlu0 %v1510_v21 }
 0x401   :  { %v1433_v22 = vpop.f32.mrb[18].mxu1 }
 0x402   :  { %v1357_v23 = vpop.f32.mrb[12].mxu0  ;;  %v3581_v24 = vpop.f32.mrb[19].mxu1  ;;  %v4311_v37 = vsel %vm1456_vm7, -1e+18, %v1433_v22 }
 0x403   :  { %v4293_v27 = vsel %vm1456_vm7, -1e+18, %v1357_v23  ;;  %v3576_v28 = vpop.f32.mrb[13].mxu0 }
 0x404   :  { %v1516_v29 = vsel %vm1473_vm5, %v4293_v27, -inf }
 0x405   :  { %1517 = vmax.xlane.f32.xlu0 %v1516_v29 }
 0x411   :  { %2486 = vrot.lane.b32.xlu1 %v4084_v52, %s3925_s27  ;;  %v1519_v52 = vsel %vm1473_vm5, %v4311_v37, -inf }
 0x41b   :  { %2410 = vrot.lane.b32.xlu0 %v4070_v49, %s3925_s27  ;;  %v1476_v34 = vpop.xlane.xlu0 %1475 }
 0x41c   :  { %v1522_v35 = vsub.f32 %v4220_v19, %v1476_v34 }
 0x41e   :  { %v1538_v36 = vmul.f32 1.442695, %v1522_v35 }
 0x41f   :  { %2562 = vrot.lane.b32.xlu0 %v4078_v51, %s3925_s27  ;;  %v4321_v51 = vpop.permute.xlu1 %1878 }
 0x420   :  { %3770 = vpow2.f32 %v1538_v36 }
 0x423   :  { %v4323_v19 = vpop.permute.xlu1 %1954 }
 0x427   :  { %v4325_v42 = vpop.permute.xlu1 %2030 }
 0x42a   :  { %v4315_v41 = vpop.eup %3770 }
 0x42b   :  { %v1570_v49 = vsel %vm1473_vm5, %v4315_v41, 0.0  ;;  %v4327_v43 = vpop.permute.xlu1 %2182 }
 0x435   :  { %1520 = vmax.xlane.f32.xlu1 %v1519_v52 }
 0x43e   :  { %1571 = vadd.xlane.f32.xlu0 %v1570_v49 }
 0x446   :  { %2638 = vrot.lane.b32.xlu1 %v4092_v54, %s3925_s27 }
 0x475   :  { %v1479_v44 = vpop.xlane.xlu1 %1478  ;;  %v1482_v45 = vpop.xlane.xlu0 %1481 }
 0x476   :  { %v1523_v46 = vsub.f32 %v4228_v25, %v1479_v44  ;;  %v1524_v47 = vsub.f32 %v4231_v26, %v1482_v45 }
 0x478   :  { %v1540_v55 = vmul.f32 1.442695, %v1523_v46  ;;  %v1542_v57 = vmul.f32 1.442695, %v1524_v47 }
 0x479   :  { %v1485_v58 = vpop.xlane.xlu0 %1484 }
 0x47a   :  { %3772 = vpow2.f32 %v1540_v55  ;;  %v1525_v54 = vsub.f32 %v4238_v32, %v1485_v58 }
 0x47b   :  { %3774 = vpow2.f32 %v1542_v57 }
 0x47c   :  { %v1544_v59 = vmul.f32 1.442695, %v1525_v54 }
 0x47d   :  { %v1491_v60 = vpop.xlane.xlu1 %1490  ;;  %v1488_v61 = vpop.xlane.xlu0 %1487 }
 0x47e   :  { %3776 = vpow2.f32 %v1544_v59  ;;  %v1527_v0 = vsub.f32 %v4246_v39, %v1491_v60  ;;  %v1526_v1 = vsub.f32 %v4243_v38, %v1488_v61 }
 0x480   :  { %v1548_v2 = vmul.f32 1.442695, %v1527_v0  ;;  %v1546_v3 = vmul.f32 1.442695, %v1526_v1 }
 0x481   :  { %v1497_v25 = vpop.xlane.xlu1 %1496  ;;  %v1494_v4 = vpop.xlane.xlu0 %1493 }
 0x482   :  { %3778 = vpow2.f32 %v1548_v2  ;;  %v1529_v26 = vsub.f32 %v4256_v50, %v1497_v25  ;;  %v1528_v5 = vsub.f32 %v4253_v48, %v1494_v4 }
 0x483   :  { %3780 = vpow2.f32 %v1546_v3 }
 0x484   :  { %v4336_v32 = vpop.eup %3772  ;;  %v1552_v9 = vmul.f32 1.442695, %v1529_v26  ;;  %v1550_v10 = vmul.f32 1.442695, %v1528_v5 }
 0x485   :  { %v4338_v11 = vpop.eup %3774  ;;  %v1503_v12 = vpop.xlane.xlu1 %1502  ;;  %v1573_v38 = vsel %vm1473_vm5, %v4336_v32, 0.0 }
 0x486   :  { %v1500_v39 = vpop.xlane.xlu0 %1499  ;;  %3782 = vpow2.f32 %v1552_v9  ;;  %v1531_v13 = vsub.f32 %v4266_v63, %v1503_v12  ;;  %1574 = vadd.xlane.f32.xlu1 %v1573_v38  ;;  %v1576_v48 = vsel %vm1473_vm5, %v4338_v11, 0.0 }
 0x487   :  { %v1530_v14 = vsub.f32 %v4263_v62, %v1500_v39  ;;  %3784 = vpow2.f32 %v1550_v10  ;;  %1577 = vadd.xlane.f32.xlu0 %v1576_v48 }
 0x488   :  { %v4346_v50 = vpop.eup %3776  ;;  %v1556_v17 = vmul.f32 1.442695, %v1531_v13 }
 0x489   :  { %v1554_v18 = vmul.f32 1.442695, %v1530_v14  ;;  %v1509_v20 = vpop.xlane.xlu1 %1508  ;;  %v1579_v22 = vsel %vm1473_vm5, %v4346_v50, 0.0 }
 0x48a   :  { %v1506_v21 = vpop.xlane.xlu0 %1505  ;;  %3786 = vpow2.f32 %v1556_v17  ;;  %v1533_v63 = vsub.f32 %v4276_v7, %v1509_v20  ;;  %1580 = vadd.xlane.f32.xlu1 %v1579_v22 }
 0x48b   :  { %v1532_v62 = vsub.f32 %v4273_v6, %v1506_v21  ;;  %3788 = vpow2.f32 %v1554_v18 }
 0x48c   :  { %v4352_v23 = vpop.eup %3778  ;;  %v1560_v24 = vmul.f32 1.442695, %v1533_v63 }
 0x48d   :  { %v1558_v28 = vmul.f32 1.442695, %v1532_v62  ;;  %v4354_v29 = vpop.eup %3780  ;;  %v1515_v34 = vpop.xlane.xlu1 %1514  ;;  %v1585_v36 = vsel %vm1473_vm5, %v4352_v23, 0.0 }
 0x48e   :  { %v1512_v35 = vpop.xlane.xlu0 %1511  ;;  %3790 = vpow2.f32 %v1560_v24  ;;  %v1535_v52 = vsub.f32 %v4286_v16, %v1515_v34  ;;  %1586 = vadd.xlane.f32.xlu1 %v1585_v36  ;;  %v1582_v6 = vsel %vm1473_vm5, %v4354_v29, 0.0 }
 0x48f   :  { %v1534_v7 = vsub.f32 %v4283_v15, %v1512_v35  ;;  %3792 = vpow2.f32 %v1558_v28  ;;  %1583 = vadd.xlane.f32.xlu0 %v1582_v6 }
 0x490   :  { %v4362_v49 = vpop.eup %3782  ;;  %v1564_v44 = vmul.f32 1.442695, %v1535_v52 }
 0x491   :  { %v1562_v45 = vmul.f32 1.442695, %v1534_v7  ;;  %v4364_v46 = vpop.eup %3784  ;;  %v1591_v47 = vsel %vm1473_vm5, %v4362_v49, 0.0  ;;  %v4401_v9 = vpop.permute.xlu1 %2486 }
 0x492   :  { %3794 = vpow2.f32 %v1564_v44  ;;  %v1518_v55 = vpop.xlane.xlu0 %1517  ;;  %1592 = vadd.xlane.f32.xlu1 %v1591_v47  ;;  %v1588_v15 = vsel %vm1473_vm5, %v4364_v46, 0.0 }
 0x493   :  { %3796 = vpow2.f32 %v1562_v45  ;;  %v1536_v16 = vsub.f32 %v4293_v27, %v1518_v55  ;;  %1589 = vadd.xlane.f32.xlu0 %v1588_v15 }
 0x494   :  { %v4371_v57 = vpop.eup %3786 }
 0x495   :  { %v4373_v58 = vpop.eup %3788  ;;  %v1566_v54 = vmul.f32 1.442695, %v1536_v16  ;;  %v1597_v59 = vsel %vm1473_vm5, %v4371_v57, 0.0 }
 0x496   :  { %1598 = vadd.xlane.f32.xlu1 %v1597_v59  ;;  %v1594_v60 = vsel %vm1473_vm5, %v4373_v58, 0.0  ;;  %v4403_v10 = vpop.permute.xlu0 %2410 }
 0x497   :  { %3798 = vpow2.f32 %v1566_v54  ;;  %1595 = vadd.xlane.f32.xlu0 %v1594_v60 }
 0x498   :  { %v4379_v61 = vpop.eup %3790 }
 0x499   :  { %v4381_v0 = vpop.eup %3792  ;;  %v1603_v27 = vsel %vm1473_vm5, %v4379_v61, 0.0 }
 0x49a   :  { %1604 = vadd.xlane.f32.xlu1 %v1603_v27  ;;  %v1600_v1 = vsel %vm1473_vm5, %v4381_v0, 0.0  ;;  %v4406_v13 = vpop.permute.xlu0 %2562 }
 0x49b   :  { %1601 = vadd.xlane.f32.xlu0 %v1600_v1 }
 0x49c   :  { %v4387_v2 = vpop.eup %3794 }
 0x49d   :  { %v4389_v3 = vpop.eup %3796  ;;  %v1609_v25 = vsel %vm1473_vm5, %v4387_v2, 0.0 }
 0x49e   :  { %1610 = vadd.xlane.f32.xlu1 %v1609_v25  ;;  %v1606_v4 = vsel %vm1473_vm5, %v4389_v3, 0.0 }
 0x49f   :  { %1607 = vadd.xlane.f32.xlu0 %v1606_v4 }
 0x4a1   :  { %v4395_v26 = vpop.eup %3798 }
 0x4a2   :  { %v1612_v5 = vsel %vm1473_vm5, %v4395_v26, 0.0 }
 0x4a3   :  { %1613 = vadd.xlane.f32.xlu1 %v1612_v5 }
 0x4b4   :  { %2790 = vrot.lane.b32.xlu1 %v4100_v56, %s3925_s27 }
 0x4c2   :  { %v1521_v12 = vpop.xlane.xlu1 %1520 }
 0x4c3   :  { %v1537_v39 = vsub.f32 %v4311_v37, %v1521_v12 }
 0x4c5   :  { %v1568_v38 = vmul.f32 1.442695, %v1537_v39 }
 0x4c6   :  { %v4423_v37 = vpop.permute.xlu1 %2638 }
 0x4c7   :  { %3800 = vpow2.f32 %v1568_v38 }
 0x4cb   :  { %v1572_v14 = vpop.xlane.xlu0 %1571 }
 0x4cc   :  { %3802 = vrcp.f32 %v1572_v14 }
 0x4d1   :  { %v4408_v48 = vpop.eup %3800 }
 0x4d2   :  { %v1615_v17 = vsel %vm1473_vm5, %v4408_v48, 0.0 }
 0x4d3   :  { %1616 = vadd.xlane.f32.xlu0 %v1615_v17 }
 0x4d6   :  { %v3803_v56 = vpop.eup %3802 }
 0x4d7   :  { %v4413_v18 = vmul.f32 %v3803_v56, %v4315_v41 }
 0x4d9   :  { %3585 = vmatmul.mubr.msk.f32.vlgmr.msra.gmra.mrb[14].mxu0 %vm1473_vm5, %v4413_v18  ;;  %v3262_v16 = vsel %vm1473_vm5, %v4413_v18, 0.0 }
 0x4da   :  { %3593 = vmatpush3.msra.mxu0 %v4301_v31  ;;  %3594 = vmatprep.mubr.msk.f32.mxu0 %vm3923_vm1, %v3921_v40 }
 0x4db   :  { %3602 = vmatprep.subr.mxu0 %v3921_v40 }
 0x4e9   :  { %2714 = vrot.lane.b32.xlu0 %v4086_v53, %s3925_s27 }
 0x513   :  { %v1575_v20 = vpop.xlane.xlu1 %1574 }
 0x514   :  { %3804 = vrcp.f32 %v1575_v20  ;;  %v1578_v21 = vpop.xlane.xlu0 %1577 }
 0x515   :  { %3806 = vrcp.f32 %v1578_v21 }
 0x517   :  { %v1581_v41 = vpop.xlane.xlu1 %1580 }
 0x518   :  { %3808 = vrcp.f32 %v1581_v41 }
 0x51b   :  { %v1587_v22 = vpop.xlane.xlu1 %1586 }
 0x51c   :  { %3810 = vrcp.f32 %v1587_v22  ;;  %v1584_v63 = vpop.xlane.xlu0 %1583 }
 0x51d   :  { %3812 = vrcp.f32 %v1584_v63 }
 0x51e   :  { %v3805_v31 = vpop.eup %3804 }
 0x51f   :  { %v3807_v62 = vpop.eup %3806  ;;  %v1635_v24 = vmul.f32 %v3805_v31, %v4336_v32  ;;  %v1593_v28 = vpop.xlane.xlu1 %1592 }
 0x520   :  { %v4427_v34 = vmul.f32 %v3807_v62, %v4338_v11  ;;  %3814 = vrcp.f32 %v1593_v28  ;;  %v1590_v53 = vpop.xlane.xlu0 %1589 }
 0x521   :  { %3816 = vrcp.f32 %v1590_v53  ;;  %3590 = vmatmul.mubr.msk.f32.vlgmr.msra.gmra.mrb[20].mxu1 %vm1473_vm5, %v1635_v24  ;;  %v3265_v15 = vsel %vm1473_vm5, %v1635_v24, 0.0 }
 0x522   :  { %v3809_v35 = vpop.eup %3808  ;;  %3595 = vmatmul.mubr.msk.f32.vlgmr.msra.gmra.mrb[16].mxu0 %vm1473_vm5, %v4427_v34  ;;  %3598 = vmatpush3.msra.mxu1 %v4321_v51 }
 0x523   :  { %v4434_v36 = vmul.f32 %v3809_v35, %v4346_v50  ;;  %3603 = vmatpush3.msra.mxu0 %v4323_v19  ;;  %v1599_v32 = vpop.xlane.xlu1 %1598  ;;  %3599 = vmatprep.mubr.msk.f32.mxu1 %vm3923_vm1, %v3921_v40 }
 0x524   :  { %3818 = vrcp.f32 %v1599_v32  ;;  %v1596_v11 = vpop.xlane.xlu0 %1595  ;;  %3607 = vmatprep.subr.mxu1 %v3921_v40  ;;  %3604 = vmatprep.mubr.msk.f32.mxu0 %vm3923_vm1, %v3921_v40 }
 0x525   :  { %3820 = vrcp.f32 %v1596_v11  ;;  %3600 = vmatmul.mubr.msk.f32.vlgmr.msra.gmra.mrb[22].mxu1 %vm1473_vm5, %v4434_v36  ;;  %3612 = vmatprep.subr.mxu0 %v3921_v40  ;;  %v3271_v25 = vsel %vm1473_vm5, %v4434_v36, 0.0 }
 0x526   :  { %v3811_v51 = vpop.eup %3810  ;;  %3608 = vmatpush3.msra.mxu1 %v4325_v42  ;;  %3609 = vmatprep.mubr.msk.f32.mxu1 %vm3923_vm1, %v3921_v40 }
 0x527   :  { %v3813_v19 = vpop.eup %3812  ;;  %v4449_v50 = vmul.f32 %v3811_v51, %v4352_v23  ;;  %v1605_v52 = vpop.xlane.xlu1 %1604  ;;  %3617 = vmatprep.subr.mxu1 %v3921_v40 }
 0x528   :  { %v4453_v7 = vmul.f32 %v3813_v19, %v4354_v29  ;;  %3822 = vrcp.f32 %v1605_v52  ;;  %v1602_v6 = vpop.xlane.xlu0 %1601 }
 0x529   :  { %3824 = vrcp.f32 %v1602_v6  ;;  %3610 = vmatmul.mubr.msk.f32.vlgmr.msra.gmra.mrb[24].mxu1 %vm1473_vm5, %v4449_v50  ;;  %v3277_v56 = vsel %vm1473_vm5, %v4449_v50, 0.0 }
 0x52a   :  { %v3815_v42 = vpop.eup %3814  ;;  %3605 = vmatmul.mubr.msk.f32.vlgmr.msra.gmra.mrb[18].mxu0 %vm1473_vm5, %v4453_v7  ;;  %3618 = vmatpush3.msra.mxu1 %v4327_v43 }
 0x52b   :  { %v3817_v23 = vpop.eup %3816  ;;  %v4461_v44 = vmul.f32 %v3815_v42, %v4362_v49  ;;  %3613 = vmatpush3.msra.mxu0 %v4307_v33  ;;  %v1611_v29 = vpop.xlane.xlu1 %1610  ;;  %3614 = vmatprep.mubr.msk.f32.mxu0 %vm3923_vm1, %v3921_v40 }
 0x52c   :  { %v4467_v45 = vmul.f32 %v3817_v23, %v4364_v46  ;;  %3826 = vrcp.f32 %v1611_v29  ;;  %v1608_v47 = vpop.xlane.xlu0 %1607  ;;  %3619 = vmatprep.mubr.msk.f32.mxu1 %vm3923_vm1, %v3921_v40  ;;  %3622 = vmatprep.subr.mxu0 %v3921_v40 }
 0x52d   :  { %3828 = vrcp.f32 %v1608_v47  ;;  %3627 = vmatprep.subr.mxu1 %v3921_v40  ;;  %3620 = vmatmul.mubr.msk.f32.vlgmr.msra.gmra.mrb[26].mxu1 %vm1473_vm5, %v4461_v44  ;;  %v3283_v36 = vsel %vm1473_vm5, %v4461_v44, 0.0 }
 0x52e   :  { %v3819_v33 = vpop.eup %3818  ;;  %3615 = vmatmul.mubr.msk.f32.vlgmr.msra.gmra.mrb[20].mxu0 %vm1473_vm5, %v4467_v45  ;;  %3628 = vmatpush3.msra.mxu1 %v4204_v8  ;;  %v3280_v62 = vsel %vm1473_vm5, %v4467_v45, 0.0 }
 0x52f   :  { %v3821_v43 = vpop.eup %3820  ;;  %v1643_v49 = vmul.f32 %v3819_v33, %v4371_v57  ;;  %3623 = vmatpush3.msra.mxu0 %v4299_v30  ;;  %3624 = vmatprep.mubr.msk.f32.mxu0 %vm3923_vm1, %v3921_v40 }
 0x530   :  { %v1642_v46 = vmul.f32 %v3821_v43, %v4373_v58  ;;  %v1614_v55 = vpop.xlane.xlu1 %1613  ;;  %3629 = vmatprep.mubr.msk.f32.mxu1 %vm3923_vm1, %v3921_v40  ;;  %3632 = vmatprep.subr.mxu0 %v3921_v40 }
 0x531   :  { %v3266_v8 = vsel %vm1473_vm5, %v1643_v49, 0.0  ;;  %3830 = vrcp.f32 %v1614_v55  ;;  %3637 = vmatprep.subr.mxu1 %v3921_v40  ;;  %3630 = vmatmul.mubr.msk.f32.vlgmr.msra.gmra.mrb[28].mxu1 %vm1473_vm5, %v1643_v49 }
 0x532   :  { %v3823_v30 = vpop.eup %3822  ;;  %v3267_v57 = vadd.f32 %v3266_v8, %v3265_v15  ;;  %v3263_v58 = vsel %vm1473_vm5, %v1642_v46, 0.0  ;;  %3625 = vmatmul.mubr.msk.f32.vlgmr.msra.gmra.mrb[22].mxu0 %vm1473_vm5, %v1642_v46  ;;  %3638 = vmatpush3.msra.mxu1 %v4401_v9  ;;  %v3268_v9 = vsel %vm1473_vm5, %v4427_v34, 0.0 }
 0x533   :  { %v3825_v54 = vpop.eup %3824  ;;  %v3264_v59 = vadd.f32 %v3263_v58, %v3262_v16  ;;  %v1645_v60 = vmul.f32 %v3823_v30, %v4379_v61  ;;  %3633 = vmatpush3.msra.mxu0 %v4403_v10  ;;  %3634 = vmatprep.mubr.msk.f32.mxu0 %vm3923_vm1, %v3921_v40 }
 0x534   :  { %v3287_v27 = vmul.f32 0.125, %v3267_v57  ;;  %v1644_v1 = vmul.f32 %v3825_v54, %v4381_v0  ;;  %3639 = vmatprep.mubr.msk.f32.mxu1 %vm3923_vm1, %v3921_v40  ;;  %3642 = vmatprep.subr.mxu0 %v3921_v40 }
 0x535   :  { %v3286_v4 = vmul.f32 0.125, %v3264_v59  ;;  %v3272_v5 = vsel %vm1473_vm5, %v1645_v60, 0.0  ;;  %3647 = vmatprep.subr.mxu1 %v3921_v40  ;;  %3640 = vmatmul.mubr.msk.f32.vlgmr.msra.gmra.mrb[30].mxu1 %vm1473_vm5, %v1645_v60 }
 0x536   :  { %v3827_v61 = vpop.eup %3826  ;;  %3295 = vst.msk [vmem:[#allocation6 + $0x8] sm:$0xff] %vm1473_vm5, %v3287_v27  ;;  %v3273_v0 = vadd.f32 %v3272_v5, %v3271_v25  ;;  %v3269_v10 = vsel %vm1473_vm5, %v1644_v1, 0.0  ;;  %3635 = vmatmul.mubr.msk.f32.vlgmr.msra.gmra.mrb[24].mxu0 %vm1473_vm5, %v1644_v1  ;;  %3648 = vmatpush3.msra.mxu1 %v4423_v37  ;;  %v2941_v25 = vld [vmem:[%s4691_s4] sm:$0xff]  ;;  %v2943_v5 = vld [vmem:[%s4691_s4 + $0x10] sm:$0xff] }
 0x537   :  { %v3829_v12 = vpop.eup %3828  ;;  %3294 = vst.msk [vmem:[#allocation6] sm:$0xff] %vm1473_vm5, %v3286_v4  ;;  %v3270_v39 = vadd.f32 %v3269_v10, %v3268_v9  ;;  %v1647_v38 = vmul.f32 %v3827_v61, %v4387_v2  ;;  %3643 = vmatpush3.msra.mxu0 %v4406_v13  ;;  %3644 = vmatprep.mubr.msk.f32.mxu0 %vm3923_vm1, %v3921_v40  ;;  %v2791_v2 = vpop.permute.xlu1 %2790  ;;  %v3274_v13 = vsel %vm1473_vm5, %v4453_v7, 0.0  ;;  %v2942_v4 = vld [vmem:[%s4691_s4 + $0x8] sm:$0xff]  ;;  %v2944_v9 = vld [vmem:[%s4691_s4 + $0x18] sm:$0xff] }
 0x538   :  { %v3289_v14 = vmul.f32 0.125, %v3273_v0  ;;  %v1646_v17 = vmul.f32 %v3829_v12, %v4389_v3  ;;  %3649 = vmatprep.mubr.msk.f32.mxu1 %vm3923_vm1, %v3921_v40  ;;  %3657 = vmatprep.subr.mxu1 %v3921_v40  ;;  %v3711_v61 = vpack.c.bf16 %v2942_v4, %v2941_v25  ;;  %v3715_v0 = vpack.c.bf16 %v2944_v9, %v2943_v5  ;;  %v3164_v4 = vld [vmem:[%s4694_s7] sm:$0xff]  ;;  %v3165_v5 = vld [vmem:[%s4694_s7 + $0x8] sm:$0xff] }
 0x539   :  { %v3288_v18 = vmul.f32 0.125, %v3270_v39  ;;  %v3278_v37 = vsel %vm1473_vm5, %v1647_v38, 0.0  ;;  %3650 = vmatmul.mubr.msk.f32.vlgmr.msra.gmra.mrb[32].mxu1 %vm1473_vm5, %v1647_v38  ;;  %3652 = vmatprep.subr.mxu0 %v3921_v40  ;;  %v3727_v9 = vpack.c.bf16 %v3165_v5, %v3164_v4 }
 0x53a   :  { %3297 = vst.msk [vmem:[#allocation6 + $0x18] sm:$0xff] %vm1473_vm5, %v3289_v14  ;;  %v3279_v3 = vadd.f32 %v3278_v37, %v3277_v56  ;;  %v3275_v20 = vsel %vm1473_vm5, %v1646_v17, 0.0  ;;  %3645 = vmatmul.mubr.msk.f32.vlgmr.msra.gmra.mrb[26].mxu0 %vm1473_vm5, %v1646_v17  ;;  %3658 = vmatpush3.msra.mxu1 %v2791_v2 }
 0x53b   :  { %v3831_v21 = vpop.eup %3830  ;;  %3296 = vst.msk [vmem:[#allocation6 + $0x10] sm:$0xff] %vm1473_vm5, %v3288_v18  ;;  %v3276_v41 = vadd.f32 %v3275_v20, %v3274_v13  ;;  %3654 = vmatprep.mubr.msk.f32.mxu0 %vm3923_vm1, %v3921_v40  ;;  %3659 = vmatprep.mubr.msk.f32.mxu1 %vm3923_vm1, %v3921_v40 }
 0x53c   :  { %v3291_v22 = vmul.f32 0.125, %v3279_v3  ;;  %v1648_v63 = vmul.f32 %v3831_v21, %v4395_v26 }
 0x53d   :  { %v3290_v31 = vmul.f32 0.125, %v3276_v41 }
 0x53e   :  { %3299 = vst.msk [vmem:[#allocation6 + $0x28] sm:$0xff] %vm1473_vm5, %v3291_v22  ;;  %v3281_v24 = vsel %vm1473_vm5, %v1648_v63, 0.0 }
 0x53f   :  { %3298 = vst.msk [vmem:[#allocation6 + $0x20] sm:$0xff] %vm1473_vm5, %v3290_v31  ;;  %v3282_v28 = vadd.f32 %v3281_v24, %v3280_v62 }
 0x541   :  { %v3292_v34 = vmul.f32 0.125, %v3282_v28 }
 0x543   :  { %3300 = vst.msk [vmem:[#allocation6 + $0x30] sm:$0xff] %vm1473_vm5, %v3292_v34 }
 0x560   :  { %v1617_v53 = vpop.xlane.xlu0 %1616 }
 0x561   :  { %3832 = vrcp.f32 %v1617_v53 }
 0x564   :  { %v2715_v40 = vpop.permute.xlu0 %2714 }
 0x565   :  { %3653 = vmatpush3.msra.mxu0 %v2715_v40 }
 0x566   :  { %3655 = vmatmul.mubr.msk.f32.vlgmr.msra.gmra.mrb[28].mxu0 %vm1473_vm5, %v1648_v63  ;;  %3712 = vmatprep.subr.bf16.mxu0 %v3711_v61 }
 0x567   :  { %3714 = vmatpush3.bf16.msra.mxu0 %v3711_v61  ;;  %v3166_v61 = vld [vmem:[%s4694_s7 + $0x10] sm:$0xff] }
 0x568   :  { %3716 = vmatprep.subr.bf16.mxu0 %v3715_v0 }
 0x56b   :  { %v3833_v26 = vpop.eup %3832  ;;  %3718 = vmatpush3.bf16.msra.mxu0 %v3715_v0  ;;  %v3167_v0 = vld [vmem:[%s4694_s7 + $0x18] sm:$0xff] }
 0x56c   :  { %v1649_v35 = vmul.f32 %v3833_v26, %v4408_v48  ;;  %3728 = vmatprep.subr.bf16.mxu0 %v3727_v9 }
 0x56e   :  { %v3284_v32 = vsel %vm1473_vm5, %v1649_v35, 0.0  ;;  %3660 = vmatmul.mubr.msk.f32.vlgmr.msra.gmra.mrb[34].mxu1 %vm1473_vm5, %v1649_v35 }
 0x56f   :  { %v3285_v11 = vadd.f32 %v3284_v32, %v3283_v36 }
 0x571   :  { %v3293_v51 = vmul.f32 0.125, %v3285_v11 }
 0x573   :  { %3301 = vst.msk [vmem:[#allocation6 + $0x38] sm:$0xff] %vm1473_vm5, %v3293_v51 }
 0x5ac   :  { %v4552_v19 = vpop.f32.mrb[14].mxu0 }
 0x5ad   :  { %v3586_v50 = vpop.f32.mrb[15].mxu0 }
 0x5f4   :  { %v1798_v52 = vpop.f32.mrb[20].mxu1 }
 0x5f5   :  { %v1874_v7 = vpop.f32.mrb[16].mxu0  ;;  %v3591_v6 = vpop.f32.mrb[21].mxu1  ;;  %2868 = vrot.lane.b32.xlu0 %v1798_v52, %s3927_s1  ;;  %v3388_v52 = vld [vmem:[%s4695_s8 + $0x4] ss:$0 sm:$0xff] }
 0x5f6   :  { %v3596_v48 = vpop.f32.mrb[17].mxu0 }
 0x5f8   :  { %v1950_v42 = vpop.f32.mrb[22].mxu1 }
 0x5f9   :  { %v3601_v23 = vpop.f32.mrb[23].mxu1  ;;  %2876 = vrot.lane.b32.xlu0 %v1874_v7, %s3914_s24 }
 0x5fa   :  { %v3838_v23 = vld [vmem:[#allocation2 + $0x8] sm:$0xff] }
 0x5fc   :  { %v2102_v44 = vpop.f32.mrb[24].mxu1 }
 0x5fd   :  { %v2026_v29 = vpop.f32.mrb[18].mxu0  ;;  %v3611_v45 = vpop.f32.mrb[25].mxu1  ;;  %2884 = vrot.lane.b32.xlu0 %v1950_v42, %s3928_s12 }
 0x5fe   :  { %v3606_v47 = vpop.f32.mrb[19].mxu0 }
 0x600   :  { %v2254_v33 = vpop.f32.mrb[26].mxu1 }
 0x601   :  { %v2178_v43 = vpop.f32.mrb[20].mxu0  ;;  %v3621_v49 = vpop.f32.mrb[27].mxu1  ;;  %2892 = vrot.lane.b32.xlu0 %v2026_v29, %s3929_s13  ;;  %v3839_v29 = vld [vmem:[#allocation2] sm:$0xff] }
 0x602   :  { %v3616_v46 = vpop.f32.mrb[21].mxu0 }
 0x604   :  { %v2406_v55 = vpop.f32.mrb[28].mxu1 }
 0x605   :  { %v4555_v15 = vpop.f32.mrb[22].mxu0  ;;  %v3631_v8 = vpop.f32.mrb[29].mxu1  ;;  %2870 = vrot.lane.b32.xlu1 %v2406_v55, %s3927_s1  ;;  %2900 = vrot.lane.b32.xlu0 %v2102_v44, %s3930_s14  ;;  %s3319_s1 = sshll.u32 %s3933_s11, 4  ;;  %s3320_s1 = int_to_ptr.vmem [resolvable:$true] %s3319_s1 }
 0x606   :  { %v3626_v30 = vpop.f32.mrb[23].mxu0  ;;  %p3867_p9 = scmp.lt.s32.totalorder %s3320_s1, %s3320_s1 }
 0x608   :  { %v2558_v16 = vpop.f32.mrb[30].mxu1 }
 0x609   :  { %v2482_v57 = vpop.f32.mrb[24].mxu0  ;;  %v3641_v58 = vpop.f32.mrb[31].mxu1  ;;  %2908 = vrot.lane.b32.xlu0 %v2178_v43, %s3931_s15 }
 0x60a   :  { %2878 = vrot.lane.b32.xlu1 %v2482_v57, %s3914_s24  ;;  %v3636_v54 = vpop.f32.mrb[25].mxu0 }
 0x60b   :  { %v3070_v54 = vld [vmem:[%s4692_s5] sm:$0xff] }
 0x60c   :  { %v2710_v59 = vpop.f32.mrb[32].mxu1 }
 0x60d   :  { %v2634_v60 = vpop.f32.mrb[26].mxu0  ;;  %v3651_v27 = vpop.f32.mrb[33].mxu1  ;;  %2916 = vrot.lane.b32.xlu0 %v2254_v33, %s3932_s2 }
 0x60e   :  { %2886 = vrot.lane.b32.xlu1 %v2558_v16, %s3928_s12  ;;  %v3646_v1 = vpop.f32.mrb[27].mxu0  ;;  %v3072_v27 = vld [vmem:[%s4692_s5 + $0x10] sm:$0xff] }
 0x60f   :  { %v3073_v1 = vld [vmem:[%s4692_s5 + $0x18] sm:$0xff] }
 0x610   :  { %v3723_v25 = vpack.c.bf16 %v3073_v1, %v3072_v27 }
 0x612   :  { %2894 = vrot.lane.b32.xlu1 %v2634_v60, %s3929_s13 }
 0x616   :  { %2902 = vrot.lane.b32.xlu1 %v2710_v59, %s3930_s14  ;;  %v3071_v59 = vld [vmem:[%s4692_s5 + $0x8] sm:$0xff] }
 0x617   :  { %v3719_v60 = vpack.c.bf16 %v3071_v59, %v3070_v54 }
 0x619   :  { %3720 = vmatprep.subr.bf16.mxu1 %v3719_v60 }
 0x61a   :  { %3722 = vmatpush3.bf16.msra.mxu1 %v3719_v60 }
 0x61b   :  { %3724 = vmatprep.subr.bf16.mxu1 %v3723_v25 }
 0x61e   :  { %3726 = vmatpush3.bf16.msra.mxu1 %v3723_v25 }
 0x639   :  { %v2786_v10 = vpop.f32.mrb[28].mxu0 }
 0x63a   :  { %2910 = vrot.lane.b32.xlu1 %v2786_v10, %s3931_s15  ;;  %v3656_v12 = vpop.f32.mrb[29].mxu0  ;;  %v3731_v10 = vpack.c.bf16 %v3167_v0, %v3166_v61 }
 0x63b   :  { %v3168_v12 = vld [vmem:[%s4694_s7 + $0x20] sm:$0xff] }
 0x641   :  { %v2862_v39 = vpop.f32.mrb[34].mxu1 }
 0x642   :  { %v3661_v38 = vpop.f32.mrb[35].mxu1  ;;  %2918 = vrot.lane.b32.xlu1 %v2862_v39, %s3932_s2  ;;  %v3169_v39 = vld [vmem:[%s4694_s7 + $0x28] sm:$0xff] }
 0x643   :  { %v3735_v38 = vpack.c.bf16 %v3169_v39, %v3168_v12 }
 0x667   :  { %v2869_v14 = vpop.permute.xlu0 %2868 }
 0x668   :  { %v2922_v2 = vsel %vm222_vm2, %v4552_v19, %v2869_v14 }
 0x66b   :  { %v2877_v17 = vpop.permute.xlu0 %2876 }
 0x66c   :  { %v2924_v13 = vsel %vm1473_vm5, %v2922_v2, %v2877_v17 }
 0x66f   :  { %v2885_v56 = vpop.permute.xlu0 %2884 }
 0x670   :  { %v2927_v20 = vsel %vm2926_vm8, %v2924_v13, %v2885_v56 }
 0x673   :  { %v2893_v18 = vpop.permute.xlu0 %2892 }
 0x674   :  { %v2930_v21 = vsel %vm2929_vm9, %v2927_v20, %v2893_v18 }
 0x677   :  { %v2901_v37 = vpop.permute.xlu0 %2900  ;;  %v2871_v62 = vpop.permute.xlu1 %2870 }
 0x678   :  { %v2933_v41 = vsel %vm2932_vm10, %v2930_v21, %v2901_v37  ;;  %v2923_v40 = vsel %vm222_vm2, %v4555_v15, %v2871_v62  ;;  %v3392_v21 = vld [vmem:[%s4695_s8 + $0x3] ss:$0 sm:$0xff] }
 0x67b   :  { %v2909_v3 = vpop.permute.xlu0 %2908 }
 0x67c   :  { %v2936_v22 = vsel %vm2935_vm11, %v2933_v41, %v2909_v3  ;;  %v2879_v24 = vpop.permute.xlu1 %2878  ;;  %v3391_v3 = vld [vmem:[%s4695_s8 + $0x2] ss:$0 sm:$0xff] }
 0x67d   :  { %v2925_v26 = vsel %vm1473_vm5, %v2923_v40, %v2879_v24  ;;  %v3393_v40 = vld [vmem:[%s4693_s6] ss:$0 sm:$0xff] }
 0x67f   :  { %v2917_v63 = vpop.permute.xlu0 %2916 }
 0x680   :  { %v2939_v31 = vsel %vm2938_vm12, %v2936_v22, %v2917_v63  ;;  %v2887_v28 = vpop.permute.xlu1 %2886 }
 0x681   :  { %3670 = vmatprep.mubr.msk.f32.mxu0 %vm58_vm0, %v2939_v31  ;;  %v2928_v36 = vsel %vm2926_vm8, %v2925_v26, %v2887_v28  ;;  %v3170_v28 = vld [vmem:[%s4694_s7 + $0x30] sm:$0xff] }
 0x684   :  { %v2895_v34 = vpop.permute.xlu1 %2894 }
 0x685   :  { %v2931_v32 = vsel %vm2929_vm9, %v2928_v36, %v2895_v34  ;;  %v3171_v34 = vld [vmem:[%s4694_s7 + $0x38] sm:$0xff]  ;;  %s3862_s7 = scalar_lea.vmem %s3320_s1, 1024 }
 0x686   :  { %p3863_p8 = scmp.ne.s32.totalorder %s3320_s1, %s3862_s7  ;;  %p3868_p10 = scmp.lt.s32.totalorder %s3862_s7, %s3862_s7 }
 0x688   :  { %v2903_v53 = vpop.permute.xlu1 %2902  ;;  %p3869_p11 = por %p3868_p10, %p3867_p9 }
 0x689   :  { %v2934_v11 = vsel %vm2932_vm10, %v2931_v32, %v2903_v53  ;;  %v3739_v53 = vpack.c.bf16 %v3171_v34, %v3170_v28 }
 0x68a   :  { %p3870_p12 = pnand %p3869_p11, %p3863_p8 }
 0x6ac   :  { %v2911_v35 = vpop.permute.xlu1 %2910 }
 0x6ad   :  { %v2937_v51 = vsel %vm2935_vm11, %v2934_v11, %v2911_v35 }
 0x6b4   :  { %v2919_v19 = vpop.permute.xlu1 %2918 }
 0x6b5   :  { %v2940_v50 = vsel %vm2938_vm12, %v2937_v51, %v2919_v19 }
 0x6b6   :  { %3671 = vmatmul.mubr.msk.f32.vlgmr.msra.gmra.mrb[30].mxu0 %vm58_vm0, %v2940_v50 }
 0x6b7   :  { %3730 = vmatpush3.bf16.msra.mxu0 %v3727_v9 }
 0x6b8   :  { %3732 = vmatprep.subr.bf16.mxu0 %v3731_v10 }
 0x6bb   :  { %3734 = vmatpush3.bf16.msra.mxu0 %v3731_v10 }
 0x6bc   :  { %3736 = vmatprep.subr.bf16.mxu0 %v3735_v38 }
 0x6bf   :  { %3738 = vmatpush3.bf16.msra.mxu0 %v3735_v38 }
 0x6c0   :  { %3740 = vmatprep.subr.bf16.mxu0 %v3739_v53 }
 0x6c3   :  { %3742 = vmatpush3.bf16.msra.mxu0 %v3739_v53 }
 0x789   :  { %v3672_v7 = vpop.f32.mrb[30].mxu0 }
 0x78a   :  { %v3027_v6 = vadd.f32 %v3672_v7, %v3388_v52  ;;  %v3021_v48 = vpop.f32.mrb[31].mxu0 }
 0x78b   :  { %v3022_v42 = vadd.f32 %v3388_v52, %v3021_v48 }
 0x78c   :  { %v4591_v44 = vadd.f32 %v3838_v23, %v3027_v6 }
 0x78d   :  { %v4593_v45 = vadd.f32 %v3839_v29, %v3022_v42 }
 0x78e   :  { %v3035_v47 = vsel %vm58_vm0, %v4591_v44, 0.0 }
 0x78f   :  { %3036 = vadd.xlane.f32.xlu1 %v3035_v47  ;;  %v3032_v33 = vsel %vm58_vm0, %v4593_v45, 0.0 }
 0x790   :  { %3033 = vadd.xlane.f32.xlu0 %v3032_v33 }
 0x81c   :  { %v3037_v43 = vpop.xlane.xlu1 %3036 }
 0x81d   :  { %v3039_v49 = vmul.f32 0.03125, %v3037_v43  ;;  %v3034_v46 = vpop.xlane.xlu0 %3033 }
 0x81e   :  { %v3038_v55 = vmul.f32 0.03125, %v3034_v46 }
 0x81f   :  { %v3041_v15 = vsub.f32 %v4591_v44, %v3039_v49 }
 0x820   :  { %v3040_v8 = vsub.f32 %v4593_v45, %v3038_v55 }
 0x821   :  { %v3043_v57 = vmul.f32 %v3041_v15, %v3041_v15 }
 0x822   :  { %v3042_v30 = vmul.f32 %v3040_v8, %v3040_v8 }
 0x823   :  { %v3047_v58 = vsel %vm58_vm0, %v3043_v57, 0.0 }
 0x824   :  { %v3044_v16 = vsel %vm58_vm0, %v3042_v30, 0.0 }
 0x825   :  { %3045 = vadd.xlane.f32.xlu0 %v3044_v16 }
 0x829   :  { %3048 = vadd.xlane.f32.xlu0 %v3047_v58 }
 0x8b2   :  { %v3046_v14 = vpop.xlane.xlu0 %3045 }
 0x8b3   :  { %v3050_v17 = vmul.f32 0.03125, %v3046_v14 }
 0x8b5   :  { %v3052_v56 = vadd.f32 1e-06, %v3050_v17 }
 0x8b6   :  { %v3049_v18 = vpop.xlane.xlu0 %3048 }
 0x8b7   :  { %3834 = vrsqrt.f32 %v3052_v56  ;;  %v3051_v37 = vmul.f32 0.03125, %v3049_v18 }
 0x8b9   :  { %v3053_v2 = vadd.f32 1e-06, %v3051_v37 }
 0x8bb   :  { %3836 = vrsqrt.f32 %v3053_v2 }
 0x8c1   :  { %v3835_v13 = vpop.eup %3834 }
 0x8c2   :  { %v3056_v20 = vmul.f32 %v3835_v13, %v3040_v8 }
 0x8c4   :  { %v3062_v41 = vmul.f32 %v3391_v3, %v3056_v20 }
 0x8c5   :  { %v3837_v22 = vpop.eup %3836 }
 0x8c6   :  { %v3057_v63 = vmul.f32 %v3837_v22, %v3041_v15  ;;  %v3068_v31 = vadd.f32 %v3392_v21, %v3062_v41 }
 0x8c8   :  { %v3063_v62 = vmul.f32 %v3391_v3, %v3057_v63  ;;  %3681 = vmatprep.mubr.msk.f32.mxu1 %vm58_vm0, %v3068_v31 }
 0x8ca   :  { %v3069_v24 = vadd.f32 %v3392_v21, %v3063_v62 }
 0x8cc   :  { %3682 = vmatmul.mubr.msk.f32.vlgmr.msra.gmra.mrb[36].mxu1 %vm58_vm0, %v3069_v24 }
 0x99f   :  { %v3683_v26 = vpop.f32.mrb[36].mxu1 }
 0x9a0   :  { %v3159_v35 = vadd.f32 %v3683_v26, %v3393_v40  ;;  %v3153_v36 = vpop.f32.mrb[37].mxu1 }
 0x9a1   :  { %v3154_v32 = vadd.f32 %v3393_v40, %v3153_v36 }
 0x9a2   :  { %v3163_v51 = vmax.f32 %v3159_v35, 0.0 }
 0x9a3   :  { %v3162_v11 = vmax.f32 %v3154_v32, 0.0 }
 0x9a5   :  { %3700 = vmatprep.mubr.msk.f32.mxu0 %vm3176_vm13, %v3162_v11 }
 0x9a6   :  { %3701 = vmatmul.mubr.msk.f32.vlgmr.msra.gmra.mrb[32].mxu0 %vm3176_vm13, %v3163_v51 }
 0x9a7   :  { %3873 = shalt.err (!%p3870_p12)
}
 0x9a8   :  { %s3874_s13 = scalar_lea.hbm %s4697_s10, 1024 }
 0x9a9   :  { %p3875_p13 = scmp.ne.s32.totalorder %s4697_s10, %s3874_s13  ;;  %p3878_p0 = scmp.lt.u32.totalorder %s3874_s13, %s4697_s10 }
 0x9ab   :  { %p3880_p1 = pnand %p3878_p0, %p3875_p13 }
 0x9ad   :  { %3883 = shalt.err (!%p3880_p1)
}
 0x9ae   :  { %3325 = dma.vmem_to_hbm [thread:$0]  %s3320_s1, 1024, %s4697_s10, [#allocation7], %s3913_s23, %s3913_s23, %s3914_s24  }
 0x9af   :  { %v3396_v19 = vld [vmem:[%s4695_s8 + $0x5] ss:$0 sm:$0xff]  ;;  %s3934_s20 = smov [#allocation5]  }
 0x9b0   :  { %s3307_s21 = sshll.u32 %s3934_s20, 4  ;;  %s3308_s21 = int_to_ptr.vmem [resolvable:$true] %s3307_s21 }
 0x9b1   :  { %s3884_s10 = scalar_lea.vmem %s3308_s21, 256  ;;  %p3889_p3 = scmp.lt.s32.totalorder %s3308_s21, %s3308_s21 }
 0x9b2   :  { %p3885_p2 = scmp.ne.s32.totalorder %s3308_s21, %s3884_s10  ;;  %p3890_p4 = scmp.lt.s32.totalorder %s3884_s10, %s3884_s10 }
 0x9b4   :  { %p3891_p5 = por %p3890_p4, %p3889_p3 }
 0x9b6   :  { %p3892_p6 = pnand %p3891_p5, %p3885_p2 }
 0xa79   :  { %v3702_v50 = vpop.f32.mrb[32].mxu0 }
 0xa7a   :  { %v3255_v52 = vadd.f32 %v3702_v50, %v3396_v19  ;;  %v3249_v7 = vpop.f32.mrb[33].mxu0 }
 0xa7b   :  { %v3250_v6 = vadd.f32 %v3396_v19, %v3249_v7 }
 0xa7c   :  { %v3259_v48 = vadd.f32 %v3255_v52, %v4591_v44 }
 0xa7d   :  { %v3258_v42 = vadd.f32 %v3250_v6, %v4593_v45 }
 0xa7e   :  { %3261 = vst.msk [vmem:[#allocation5 + $0x8] sm:$0xff] %vm58_vm0, %v3259_v48 }
 0xa7f   :  { %3260 = vst.msk [vmem:[#allocation5] sm:$0xff] %vm58_vm0, %v3258_v42 }
 0xa80   :  { %3895 = shalt.err (!%p3892_p6)
}
 0xa81   :  { %s3896_s25 = scalar_lea.hbm %s4696_s9, 256 }
 0xa82   :  { %p3897_p7 = scmp.ne.s32.totalorder %s4696_s9, %s3896_s25  ;;  %p3900_p8 = scmp.lt.u32.totalorder %s3896_s25, %s4696_s9 }
 0xa84   :  { %p3902_p9 = pnand %p3900_p8, %p3897_p7 }
 0xa86   :  { %3905 = shalt.err (!%p3902_p9)
}
 0xa87   :  { %3313 = dma.vmem_to_hbm [thread:$0]  %s3308_s21, 256, %s4696_s9, [#allocation4], %s3913_s23, %s3913_s23, %s3914_s24  }
 0xa88   :  { %3908 = dma.done.wait [#allocation4], 256  }
 0xa89   :  { %3909 = vsyncadd [#allocation4], 4294967040 }
 0xa8a   :  { %3910 = dma.done.wait [#allocation7], 1024  }
 0xa8b   :  { %3911 = vsyncadd [#allocation7], 4294966272 }
 0xa8c   :  { %3332 = vsyncpa [#allocation3], 1 }
 0xa8d   :  { %3333 = vsyncpa [#allocation4], 1 }
 0xa8e   :  { %3334 = vsyncpa [#allocation7], 1 }

</bundles_post_ra>
